<compile_context>
chip_gen: v7x
topology: tpu7x:2x2x1
jax: 0.10.0
libtpu: 0.0.40
codegen_flags: <defaults>
</compile_context>

<pallas_src>
import functools
import math

import jax
import jax.numpy as jnp
from jax import lax
from jax.experimental import pallas as pl
from jax.experimental.pallas import tpu as pltpu

EPS = 1e-5


def _round_up(n, m):
    return ((n + m - 1) // m) * m


def _gelu(h, approx):
    if approx:
        # tanh approximation (EUP path); not bit-identical to PyTorch's default GELU.
        c = math.sqrt(2.0 / math.pi)
        return 0.5 * h * (1.0 + jnp.tanh(c * (h + 0.044715 * h * h * h)))
    # PyTorch nn.GELU default: exact erf-based GELU.
    return 0.5 * h * (1.0 + lax.erf(h * (1.0 / math.sqrt(2.0))))


def _instance_norm_row(h, n_feat, feat_mask):
    # Row-wise InstanceNorm1d semantics for a 2-D (B, D) input: each row normalized
    # over its true D features (biased variance, eps=1e-5, no affine). Padded lanes
    # of `h` are exactly zero, so only the variance term needs explicit masking.
    inv_n = 1.0 / float(n_feat)
    mean = jnp.sum(h, axis=-1, keepdims=True) * inv_n
    centered = h - mean
    if feat_mask is not None:
        centered = centered * feat_mask
    var = jnp.sum(centered * centered, axis=-1, keepdims=True) * inv_n
    return centered * lax.rsqrt(var + EPS)


def _residual_block_kernel(
    x_ref,
    w1_ref, b1_ref,
    w2_ref, b2_ref,
    w3_ref, b3_ref,
    wr_ref, br_ref,
    o_ref,
    *,
    n_feat,
    needs_mask,
    approx_gelu,
    compute_dtype,
):
    x = x_ref[...]

    feat_mask = None
    if needs_mask:
        col = lax.broadcasted_iota(jnp.int32, (1, o_ref.shape[-1]), 1)
        feat_mask = (col < n_feat).astype(jnp.float32)

    def linear(h, w_ref, b_ref):
        # Weights are pre-transposed to (in, out): native MXU contraction layout.
        h = h.astype(compute_dtype)
        return jnp.dot(h, w_ref[...], preferred_element_type=jnp.float32) + b_ref[...]

    # Residual path first so x's live range ends right after layer 1.
    res = linear(x, wr_ref, br_ref)

    h = _instance_norm_row(_gelu(linear(x, w1_ref, b1_ref), approx_gelu), n_feat, feat_mask)
    h = _instance_norm_row(_gelu(linear(h, w2_ref, b2_ref), approx_gelu), n_feat, feat_mask)
    h = _instance_norm_row(_gelu(linear(h, w3_ref, b3_ref), approx_gelu), n_feat, feat_mask)

    o_ref[...] = (h + res).astype(o_ref.dtype)


def residual_linear_block(x, params, *, block_rows=None,
                          weight_dtype=jnp.float32, approx_gelu=False):
    """x: (B, in_dim) f32. params: PyTorch convention w*: (out, in), b*: (1, out)."""
    B, in_dim = x.shape
    out_dim = params["w1"].shape[0]

    in_pad = _round_up(in_dim, 128)
    out_pad = _round_up(out_dim, 128)

    if block_rows is None:
        block_rows = min(_round_up(B, 8), 256)
    block_rows = _round_up(max(block_rows, 8), 8)
    b_pad = _round_up(B, block_rows)

    # Zero-pad batch rows and feature lanes (padded lanes stay exactly zero
    # through every layer because the padded weight rows/cols and biases are zero).
    x_p = jnp.pad(x, ((0, b_pad - B), (0, in_pad - in_dim)))

    def prep_w(w, rows_pad):
        wt = jnp.asarray(w).T.astype(weight_dtype)                      # (in, out)
        return jnp.pad(wt, ((0, rows_pad - wt.shape[0]), (0, out_pad - wt.shape[1])))

    def prep_b(b):
        bb = jnp.asarray(b).reshape(1, -1).astype(jnp.float32)
        return jnp.pad(bb, ((0, 0), (0, out_pad - bb.shape[1])))

    w1 = prep_w(params["w1"], in_pad);  b1 = prep_b(params["b1"])
    w2 = prep_w(params["w2"], out_pad); b2 = prep_b(params["b2"])
    w3 = prep_w(params["w3"], out_pad); b3 = prep_b(params["b3"])
    wr = prep_w(params["wr"], in_pad);  br = prep_b(params["br"])

    kernel = functools.partial(
        _residual_block_kernel,
        n_feat=out_dim,
        needs_mask=(out_pad != out_dim),
        approx_gelu=approx_gelu,
        compute_dtype=weight_dtype,
    )

    w_itemsize = jnp.dtype(weight_dtype).itemsize

    def vmem_limit(weight_bufs):
        w_bytes = (2 * in_pad * out_pad + 2 * out_pad * out_pad) * w_itemsize * weight_bufs
        b_bytes = 4 * out_pad * 4 * weight_bufs
        io_bytes = 2 * block_rows * (in_pad + out_pad) * 4
        live_bytes = 8 * block_rows * out_pad * 4
        est = int(1.5 * (w_bytes + b_bytes + io_bytes + live_bytes)) + (4 << 20)
        # Raise above the scoped defaults, but stay well inside v7x's 64 MiB VMEM.
        return int(min(max(est, 32 << 20), 56 << 20))

    def build(single_buffer_weights):
        def const_spec(shape):
            # Grid-invariant operands: index map is constant; single-buffer if possible.
            if single_buffer_weights:
                return pl.BlockSpec(shape, lambda i: (0, 0),
                                    pipeline_mode=pl.Buffered(1))
            return pl.BlockSpec(shape, lambda i: (0, 0))

        return pl.pallas_call(
            kernel,
            out_shape=jax.ShapeDtypeStruct((b_pad, out_pad), x.dtype),
            grid_spec=pltpu.PrefetchScalarGridSpec(
                num_scalar_prefetch=0,
                grid=(b_pad // block_rows,),
                in_specs=[
                    pl.BlockSpec((block_rows, in_pad), lambda i: (i, 0)),     # x tile
                    const_spec((in_pad, out_pad)),  const_spec((1, out_pad)),  # layer 1
                    const_spec((out_pad, out_pad)), const_spec((1, out_pad)),  # layer 2
                    const_spec((out_pad, out_pad)), const_spec((1, out_pad)),  # layer 3
                    const_spec((in_pad, out_pad)),  const_spec((1, out_pad)),  # residual
                ],
                out_specs=pl.BlockSpec((block_rows, out_pad), lambda i: (i, 0)),
            ),
            compiler_params=pltpu.CompilerParams(
                dimension_semantics=("parallel",),
                vmem_limit_bytes=vmem_limit(1 if single_buffer_weights else 2),
            ),
        )

    args = (x_p, w1, b1, w2, b2, w3, b3, wr, br)
    try:
        if not hasattr(pl, "Buffered"):
            raise NotImplementedError("pl.Buffered unavailable")
        out_p = build(True)(*args)
    except Exception:
        # Fallback: default double-buffering for the grid-invariant operands.
        out_p = build(False)(*args)

    return out_p[:B, :out_dim]


def init_params(key, in_dim, out_dim):
    """he_linear: kaiming_normal_(fan_in, leaky_relu, a=0) -> std = sqrt(2/fan_in); bias = 0."""
    k1, k2, k3, kr = jax.random.split(key, 4)

    def he(k, fan_out, fan_in):
        std = math.sqrt(2.0 / fan_in)
        return jax.random.normal(k, (fan_out, fan_in), jnp.float32) * std

    return {
        "w1": he(k1, out_dim, in_dim),  "b1": jnp.zeros((1, out_dim), jnp.float32),
        "w2": he(k2, out_dim, out_dim), "b2": jnp.zeros((1, out_dim), jnp.float32),
        "w3": he(k3, out_dim, out_dim), "b3": jnp.zeros((1, out_dim), jnp.float32),
        "wr": he(kr, out_dim, in_dim),  "br": jnp.zeros((1, out_dim), jnp.float32),
    }


def reference(x, p):
    def lin(h, w, b):
        return h @ w.T + b

    def post(h):
        h = 0.5 * h * (1.0 + lax.erf(h / math.sqrt(2.0)))
        mean = jnp.mean(h, axis=-1, keepdims=True)
        var = jnp.mean((h - mean) ** 2, axis=-1, keepdims=True)
        return (h - mean) / jnp.sqrt(var + EPS)

    res = lin(x, p["wr"], p["br"])
    h = post(lin(x, p["w1"], p["b1"]))
    h = post(lin(h, p["w2"], p["b2"]))
    h = post(lin(h, p["w3"], p["b3"]))
    return h + res


if __name__ == "__main__":
    key = jax.random.PRNGKey(0)
    kx, kp = jax.random.split(key)

    B, in_dim, out_dim = 16, 32, 64
    x = jax.random.normal(kx, (B, in_dim), jnp.float32)
    params = init_params(kp, in_dim, out_dim)

    ref = reference(x, params)

    # f32 path (matches the PyTorch module semantics to tight tolerance).
    out = jax.block_until_ready(residual_linear_block(x, params))
    assert out.shape == (B, out_dim)
    assert jnp.allclose(out, ref, atol=1e-4, rtol=1e-4), "f32 kernel mismatch vs reference"

    # bf16-weight fast path (MXU peak on v6e/v7x); looser tolerance by construction.
    out_bf16 = jax.block_until_ready(
        residual_linear_block(x, params, weight_dtype=jnp.bfloat16))
    assert out_bf16.shape == (B, out_dim)
    assert jnp.allclose(out_bf16, ref, atol=2e-1, rtol=2e-1), "bf16 kernel deviates too much"

    print("KERNEL_OK")
</pallas_src>

<mosaic_0001>
module attributes {stable_mosaic.version = 11 : i64} {
  func.func @_residual_block_kernel(%arg0: i32, %arg1: memref<16x128xf32, #tpu.memory_space<vmem>>, %arg2: memref<128x128xf32, #tpu.memory_space<vmem>>, %arg3: memref<1x128xf32, #tpu.memory_space<vmem>>, %arg4: memref<128x128xf32, #tpu.memory_space<vmem>>, %arg5: memref<1x128xf32, #tpu.memory_space<vmem>>, %arg6: memref<128x128xf32, #tpu.memory_space<vmem>>, %arg7: memref<1x128xf32, #tpu.memory_space<vmem>>, %arg8: memref<128x128xf32, #tpu.memory_space<vmem>>, %arg9: memref<1x128xf32, #tpu.memory_space<vmem>>, %arg10: memref<16x128xf32, #tpu.memory_space<vmem>>) attributes {dimension_semantics = [#tpu.dimension_semantics<parallel>], iteration_bounds = array<i64: 1>, scalar_prefetch = 0 : i64, scratch_operands = 0 : i64, tpu.core_type = #tpu.core_type<tc>, window_params = [{transform_indices = @transform_0, window_bounds = array<i64: 16, 128>}, {pipeline_mode = #tpu.pipeline_mode<synchronous>, transform_indices = @transform_1, window_bounds = array<i64: 128, 128>}, {pipeline_mode = #tpu.pipeline_mode<synchronous>, transform_indices = @transform_2, window_bounds = array<i64: 1, 128>}, {pipeline_mode = #tpu.pipeline_mode<synchronous>, transform_indices = @transform_3, window_bounds = array<i64: 128, 128>}, {pipeline_mode = #tpu.pipeline_mode<synchronous>, transform_indices = @transform_4, window_bounds = array<i64: 1, 128>}, {pipeline_mode = #tpu.pipeline_mode<synchronous>, transform_indices = @transform_5, window_bounds = array<i64: 128, 128>}, {pipeline_mode = #tpu.pipeline_mode<synchronous>, transform_indices = @transform_6, window_bounds = array<i64: 1, 128>}, {pipeline_mode = #tpu.pipeline_mode<synchronous>, transform_indices = @transform_7, window_bounds = array<i64: 128, 128>}, {pipeline_mode = #tpu.pipeline_mode<synchronous>, transform_indices = @transform_8, window_bounds = array<i64: 1, 128>}, {transform_indices = @transform_9, window_bounds = array<i64: 16, 128>}]} {
    %c0 = arith.constant 0 : index
    %c0_0 = arith.constant 0 : index
    %0 = vector.load %arg1[%c0, %c0_0] : memref<16x128xf32, #tpu.memory_space<vmem>>, vector<16x128xf32>
    %1 = tpu.iota {dimensions = array<i32: 1>} : vector<1x128xi32>
    %c64_i32 = arith.constant 64 : i32
    %2 = vector.broadcast %c64_i32 : i32 to vector<1x128xi32>
    %3 = arith.cmpi slt, %1, %2 : vector<1x128xi32>
    %4 = arith.extui %3 : vector<1x128xi1> to vector<1x128xi32>
    %5 = arith.sitofp %4 : vector<1x128xi32> to vector<1x128xf32>
    %c0_1 = arith.constant 0 : index
    %c0_2 = arith.constant 0 : index
    %6 = vector.load %arg8[%c0_1, %c0_2] : memref<128x128xf32, #tpu.memory_space<vmem>>, vector<128x128xf32>
    %cst = arith.constant dense<0.000000e+00> : vector<16x128xf32>
    %7 = tpu.matmul %0, %6, %cst {dimension_numbers = #tpu.dot_dimension_numbers<[1], [0], [0], [1], [0, 0, 1, 1], [], []>} : vector<16x128xf32>, vector<128x128xf32>, vector<16x128xf32> -> vector<16x128xf32>
    %c0_3 = arith.constant 0 : index
    %c0_4 = arith.constant 0 : index
    %8 = vector.load %arg9[%c0_3, %c0_4] : memref<1x128xf32, #tpu.memory_space<vmem>>, vector<1x128xf32>
    %9 = vector.broadcast %8 : vector<1x128xf32> to vector<16x128xf32>
    %10 = arith.addf %7, %9 : vector<16x128xf32>
    %c0_5 = arith.constant 0 : index
    %c0_6 = arith.constant 0 : index
    %11 = vector.load %arg2[%c0_5, %c0_6] : memref<128x128xf32, #tpu.memory_space<vmem>>, vector<128x128xf32>
    %cst_7 = arith.constant dense<0.000000e+00> : vector<16x128xf32>
    %12 = tpu.matmul %0, %11, %cst_7 {dimension_numbers = #tpu.dot_dimension_numbers<[1], [0], [0], [1], [0, 0, 1, 1], [], []>} : vector<16x128xf32>, vector<128x128xf32>, vector<16x128xf32> -> vector<16x128xf32>
    %c0_8 = arith.constant 0 : index
    %c0_9 = arith.constant 0 : index
    %13 = vector.load %arg3[%c0_8, %c0_9] : memref<1x128xf32, #tpu.memory_space<vmem>>, vector<1x128xf32>
    %14 = vector.broadcast %13 : vector<1x128xf32> to vector<16x128xf32>
    %15 = arith.addf %12, %14 : vector<16x128xf32>
    %cst_10 = arith.constant 5.000000e-01 : f32
    %16 = vector.broadcast %cst_10 : f32 to vector<16x128xf32>
    %17 = arith.mulf %16, %15 : vector<16x128xf32>
    %cst_11 = arith.constant 0.707106769 : f32
    %18 = vector.broadcast %cst_11 : f32 to vector<16x128xf32>
    %19 = arith.mulf %15, %18 : vector<16x128xf32>
    %20 = math.erf %19 : vector<16x128xf32>
    %cst_12 = arith.constant 1.000000e+00 : f32
    %21 = vector.broadcast %cst_12 : f32 to vector<16x128xf32>
    %22 = arith.addf %21, %20 : vector<16x128xf32>
    %23 = arith.mulf %17, %22 : vector<16x128xf32>
    %cst_13 = arith.constant dense<0.000000e+00> : vector<16xf32>
    %24 = vector.multi_reduction <add>, %23, %cst_13 [1] : vector<16x128xf32> to vector<16xf32>
    %25 = vector.shape_cast %24 : vector<16xf32> to vector<16x1xf32>
    %cst_14 = arith.constant 1.562500e-02 : f32
    %26 = vector.broadcast %cst_14 : f32 to vector<16x1xf32>
    %27 = arith.mulf %25, %26 : vector<16x1xf32>
    %28 = vector.broadcast %27 : vector<16x1xf32> to vector<16x128xf32>
    %29 = arith.subf %23, %28 : vector<16x128xf32>
    %30 = vector.broadcast %5 : vector<1x128xf32> to vector<16x128xf32>
    %31 = arith.mulf %29, %30 : vector<16x128xf32>
    %32 = arith.mulf %31, %31 : vector<16x128xf32>
    %cst_15 = arith.constant dense<0.000000e+00> : vector<16xf32>
    %33 = vector.multi_reduction <add>, %32, %cst_15 [1] : vector<16x128xf32> to vector<16xf32>
    %34 = vector.shape_cast %33 : vector<16xf32> to vector<16x1xf32>
    %cst_16 = arith.constant 1.562500e-02 : f32
    %35 = vector.broadcast %cst_16 : f32 to vector<16x1xf32>
    %36 = arith.mulf %34, %35 : vector<16x1xf32>
    %cst_17 = arith.constant 9.99999974E-6 : f32
    %37 = vector.broadcast %cst_17 : f32 to vector<16x1xf32>
    %38 = arith.addf %36, %37 : vector<16x1xf32>
    %39 = math.rsqrt %38 : vector<16x1xf32>
    %40 = vector.broadcast %39 : vector<16x1xf32> to vector<16x128xf32>
    %41 = arith.mulf %31, %40 : vector<16x128xf32>
    %c0_18 = arith.constant 0 : index
    %c0_19 = arith.constant 0 : index
    %42 = vector.load %arg4[%c0_18, %c0_19] : memref<128x128xf32, #tpu.memory_space<vmem>>, vector<128x128xf32>
    %cst_20 = arith.constant dense<0.000000e+00> : vector<16x128xf32>
    %43 = tpu.matmul %41, %42, %cst_20 {dimension_numbers = #tpu.dot_dimension_numbers<[1], [0], [0], [1], [0, 0, 1, 1], [], []>} : vector<16x128xf32>, vector<128x128xf32>, vector<16x128xf32> -> vector<16x128xf32>
    %c0_21 = arith.constant 0 : index
    %c0_22 = arith.constant 0 : index
    %44 = vector.load %arg5[%c0_21, %c0_22] : memref<1x128xf32, #tpu.memory_space<vmem>>, vector<1x128xf32>
    %45 = vector.broadcast %44 : vector<1x128xf32> to vector<16x128xf32>
    %46 = arith.addf %43, %45 : vector<16x128xf32>
    %cst_23 = arith.constant 5.000000e-01 : f32
    %47 = vector.broadcast %cst_23 : f32 to vector<16x128xf32>
    %48 = arith.mulf %47, %46 : vector<16x128xf32>
    %cst_24 = arith.constant 0.707106769 : f32
    %49 = vector.broadcast %cst_24 : f32 to vector<16x128xf32>
    %50 = arith.mulf %46, %49 : vector<16x128xf32>
    %51 = math.erf %50 : vector<16x128xf32>
    %cst_25 = arith.constant 1.000000e+00 : f32
    %52 = vector.broadcast %cst_25 : f32 to vector<16x128xf32>
    %53 = arith.addf %52, %51 : vector<16x128xf32>
    %54 = arith.mulf %48, %53 : vector<16x128xf32>
    %cst_26 = arith.constant dense<0.000000e+00> : vector<16xf32>
    %55 = vector.multi_reduction <add>, %54, %cst_26 [1] : vector<16x128xf32> to vector<16xf32>
    %56 = vector.shape_cast %55 : vector<16xf32> to vector<16x1xf32>
    %cst_27 = arith.constant 1.562500e-02 : f32
    %57 = vector.broadcast %cst_27 : f32 to vector<16x1xf32>
    %58 = arith.mulf %56, %57 : vector<16x1xf32>
    %59 = vector.broadcast %58 : vector<16x1xf32> to vector<16x128xf32>
    %60 = arith.subf %54, %59 : vector<16x128xf32>
    %61 = vector.broadcast %5 : vector<1x128xf32> to vector<16x128xf32>
    %62 = arith.mulf %60, %61 : vector<16x128xf32>
    %63 = arith.mulf %62, %62 : vector<16x128xf32>
    %cst_28 = arith.constant dense<0.000000e+00> : vector<16xf32>
    %64 = vector.multi_reduction <add>, %63, %cst_28 [1] : vector<16x128xf32> to vector<16xf32>
    %65 = vector.shape_cast %64 : vector<16xf32> to vector<16x1xf32>
    %cst_29 = arith.constant 1.562500e-02 : f32
    %66 = vector.broadcast %cst_29 : f32 to vector<16x1xf32>
    %67 = arith.mulf %65, %66 : vector<16x1xf32>
    %cst_30 = arith.constant 9.99999974E-6 : f32
    %68 = vector.broadcast %cst_30 : f32 to vector<16x1xf32>
    %69 = arith.addf %67, %68 : vector<16x1xf32>
    %70 = math.rsqrt %69 : vector<16x1xf32>
    %71 = vector.broadcast %70 : vector<16x1xf32> to vector<16x128xf32>
    %72 = arith.mulf %62, %71 : vector<16x128xf32>
    %c0_31 = arith.constant 0 : index
    %c0_32 = arith.constant 0 : index
    %73 = vector.load %arg6[%c0_31, %c0_32] : memref<128x128xf32, #tpu.memory_space<vmem>>, vector<128x128xf32>
    %cst_33 = arith.constant dense<0.000000e+00> : vector<16x128xf32>
    %74 = tpu.matmul %72, %73, %cst_33 {dimension_numbers = #tpu.dot_dimension_numbers<[1], [0], [0], [1], [0, 0, 1, 1], [], []>} : vector<16x128xf32>, vector<128x128xf32>, vector<16x128xf32> -> vector<16x128xf32>
    %c0_34 = arith.constant 0 : index
    %c0_35 = arith.constant 0 : index
    %75 = vector.load %arg7[%c0_34, %c0_35] : memref<1x128xf32, #tpu.memory_space<vmem>>, vector<1x128xf32>
    %76 = vector.broadcast %75 : vector<1x128xf32> to vector<16x128xf32>
    %77 = arith.addf %74, %76 : vector<16x128xf32>
    %cst_36 = arith.constant 5.000000e-01 : f32
    %78 = vector.broadcast %cst_36 : f32 to vector<16x128xf32>
    %79 = arith.mulf %78, %77 : vector<16x128xf32>
    %cst_37 = arith.constant 0.707106769 : f32
    %80 = vector.broadcast %cst_37 : f32 to vector<16x128xf32>
    %81 = arith.mulf %77, %80 : vector<16x128xf32>
    %82 = math.erf %81 : vector<16x128xf32>
    %cst_38 = arith.constant 1.000000e+00 : f32
    %83 = vector.broadcast %cst_38 : f32 to vector<16x128xf32>
    %84 = arith.addf %83, %82 : vector<16x128xf32>
    %85 = arith.mulf %79, %84 : vector<16x128xf32>
    %cst_39 = arith.constant dense<0.000000e+00> : vector<16xf32>
    %86 = vector.multi_reduction <add>, %85, %cst_39 [1] : vector<16x128xf32> to vector<16xf32>
    %87 = vector.shape_cast %86 : vector<16xf32> to vector<16x1xf32>
    %cst_40 = arith.constant 1.562500e-02 : f32
    %88 = vector.broadcast %cst_40 : f32 to vector<16x1xf32>
    %89 = arith.mulf %87, %88 : vector<16x1xf32>
    %90 = vector.broadcast %89 : vector<16x1xf32> to vector<16x128xf32>
    %91 = arith.subf %85, %90 : vector<16x128xf32>
    %92 = vector.broadcast %5 : vector<1x128xf32> to vector<16x128xf32>
    %93 = arith.mulf %91, %92 : vector<16x128xf32>
    %94 = arith.mulf %93, %93 : vector<16x128xf32>
    %cst_41 = arith.constant dense<0.000000e+00> : vector<16xf32>
    %95 = vector.multi_reduction <add>, %94, %cst_41 [1] : vector<16x128xf32> to vector<16xf32>
    %96 = vector.shape_cast %95 : vector<16xf32> to vector<16x1xf32>
    %cst_42 = arith.constant 1.562500e-02 : f32
    %97 = vector.broadcast %cst_42 : f32 to vector<16x1xf32>
    %98 = arith.mulf %96, %97 : vector<16x1xf32>
    %cst_43 = arith.constant 9.99999974E-6 : f32
    %99 = vector.broadcast %cst_43 : f32 to vector<16x1xf32>
    %100 = arith.addf %98, %99 : vector<16x1xf32>
    %101 = math.rsqrt %100 : vector<16x1xf32>
    %102 = vector.broadcast %101 : vector<16x1xf32> to vector<16x128xf32>
    %103 = arith.mulf %93, %102 : vector<16x128xf32>
    %104 = arith.addf %103, %10 : vector<16x128xf32>
    %c0_44 = arith.constant 0 : index
    %c0_45 = arith.constant 0 : index
    %105 = vector.load %arg10[%c0_44, %c0_45] : memref<16x128xf32, #tpu.memory_space<vmem>>, vector<16x128xf32>
    tpu.vector_store %arg10[%c0_44, %c0_45], %104 {strides = array<i32>} : memref<16x128xf32, #tpu.memory_space<vmem>>, vector<16x128xf32>,
    return
  }
  func.func @transform_0(%arg0: i32) -> (i32, i32) {
    %c0_i32 = arith.constant 0 : i32
    %c0_i32_0 = arith.constant 0 : i32
    return %arg0, %c0_i32 : i32, i32
  }
  func.func @transform_1(%arg0: i32) -> (i32, i32) {
    %c0_i32 = arith.constant 0 : i32
    %c0_i32_0 = arith.constant 0 : i32
    %c0_i32_1 = arith.constant 0 : i32
    return %c0_i32, %c0_i32_0 : i32, i32
  }
  func.func @transform_2(%arg0: i32) -> (i32, i32) {
    %c0_i32 = arith.constant 0 : i32
    %c0_i32_0 = arith.constant 0 : i32
    %c0_i32_1 = arith.constant 0 : i32
    return %c0_i32, %c0_i32_0 : i32, i32
  }
  func.func @transform_3(%arg0: i32) -> (i32, i32) {
    %c0_i32 = arith.constant 0 : i32
    %c0_i32_0 = arith.constant 0 : i32
    %c0_i32_1 = arith.constant 0 : i32
    return %c0_i32, %c0_i32_0 : i32, i32
  }
  func.func @transform_4(%arg0: i32) -> (i32, i32) {
    %c0_i32 = arith.constant 0 : i32
    %c0_i32_0 = arith.constant 0 : i32
    %c0_i32_1 = arith.constant 0 : i32
    return %c0_i32, %c0_i32_0 : i32, i32
  }
  func.func @transform_5(%arg0: i32) -> (i32, i32) {
    %c0_i32 = arith.constant 0 : i32
    %c0_i32_0 = arith.constant 0 : i32
    %c0_i32_1 = arith.constant 0 : i32
    return %c0_i32, %c0_i32_0 : i32, i32
  }
  func.func @transform_6(%arg0: i32) -> (i32, i32) {
    %c0_i32 = arith.constant 0 : i32
    %c0_i32_0 = arith.constant 0 : i32
    %c0_i32_1 = arith.constant 0 : i32
    return %c0_i32, %c0_i32_0 : i32, i32
  }
  func.func @transform_7(%arg0: i32) -> (i32, i32) {
    %c0_i32 = arith.constant 0 : i32
    %c0_i32_0 = arith.constant 0 : i32
    %c0_i32_1 = arith.constant 0 : i32
    return %c0_i32, %c0_i32_0 : i32, i32
  }
  func.func @transform_8(%arg0: i32) -> (i32, i32) {
    %c0_i32 = arith.constant 0 : i32
    %c0_i32_0 = arith.constant 0 : i32
    %c0_i32_1 = arith.constant 0 : i32
    return %c0_i32, %c0_i32_0 : i32, i32
  }
  func.func @transform_9(%arg0: i32) -> (i32, i32) {
    %c0_i32 = arith.constant 0 : i32
    %c0_i32_0 = arith.constant 0 : i32
    return %arg0, %c0_i32 : i32, i32
  }
}

module attributes {stable_mosaic.version = 11 : i64} {
  func.func @_residual_block_kernel(%arg0: i32, %arg1: memref<16x128xf32, #tpu.memory_space<vmem>>, %arg2: memref<128x128xf32, #tpu.memory_space<vmem>>, %arg3: memref<1x128xf32, #tpu.memory_space<vmem>>, %arg4: memref<128x128xf32, #tpu.memory_space<vmem>>, %arg5: memref<1x128xf32, #tpu.memory_space<vmem>>, %arg6: memref<128x128xf32, #tpu.memory_space<vmem>>, %arg7: memref<1x128xf32, #tpu.memory_space<vmem>>, %arg8: memref<128x128xf32, #tpu.memory_space<vmem>>, %arg9: memref<1x128xf32, #tpu.memory_space<vmem>>, %arg10: memref<16x128xf32, #tpu.memory_space<vmem>>) attributes {dimension_semantics = [#tpu.dimension_semantics<parallel>], iteration_bounds = array<i64: 1>, scalar_prefetch = 0 : i64, scratch_operands = 0 : i64, tpu.core_type = #tpu.core_type<tc>, window_params = [{transform_indices = @transform_0, window_bounds = array<i64: 16, 128>}, {pipeline_mode = #tpu.pipeline_mode<synchronous>, transform_indices = @transform_1, window_bounds = array<i64: 128, 128>}, {pipeline_mode = #tpu.pipeline_mode<synchronous>, transform_indices = @transform_2, window_bounds = array<i64: 1, 128>}, {pipeline_mode = #tpu.pipeline_mode<synchronous>, transform_indices = @transform_3, window_bounds = array<i64: 128, 128>}, {pipeline_mode = #tpu.pipeline_mode<synchronous>, transform_indices = @transform_4, window_bounds = array<i64: 1, 128>}, {pipeline_mode = #tpu.pipeline_mode<synchronous>, transform_indices = @transform_5, window_bounds = array<i64: 128, 128>}, {pipeline_mode = #tpu.pipeline_mode<synchronous>, transform_indices = @transform_6, window_bounds = array<i64: 1, 128>}, {pipeline_mode = #tpu.pipeline_mode<synchronous>, transform_indices = @transform_7, window_bounds = array<i64: 128, 128>}, {pipeline_mode = #tpu.pipeline_mode<synchronous>, transform_indices = @transform_8, window_bounds = array<i64: 1, 128>}, {transform_indices = @transform_9, window_bounds = array<i64: 16, 128>}]} {
    %c0 = arith.constant 0 : index
    %c0_0 = arith.constant 0 : index
    %0 = vector.load %arg1[%c0, %c0_0] : memref<16x128xf32, #tpu.memory_space<vmem>>, vector<16x128xf32>
    %1 = tpu.iota {dimensions = array<i32: 1>} : vector<1x128xi32>
    %c64_i32 = arith.constant 64 : i32
    %2 = vector.broadcast %c64_i32 : i32 to vector<1x128xi32>
    %3 = arith.cmpi slt, %1, %2 : vector<1x128xi32>
    %4 = arith.extui %3 : vector<1x128xi1> to vector<1x128xi32>
    %5 = arith.sitofp %4 : vector<1x128xi32> to vector<1x128xf32>
    %c0_1 = arith.constant 0 : index
    %c0_2 = arith.constant 0 : index
    %6 = vector.load %arg8[%c0_1, %c0_2] : memref<128x128xf32, #tpu.memory_space<vmem>>, vector<128x128xf32>
    %cst = arith.constant dense<0.000000e+00> : vector<16x128xf32>
    %7 = tpu.matmul %0, %6, %cst {dimension_numbers = #tpu.dot_dimension_numbers<[1], [0], [0], [1], [0, 0, 1, 1], [], []>} : vector<16x128xf32>, vector<128x128xf32>, vector<16x128xf32> -> vector<16x128xf32>
    %c0_3 = arith.constant 0 : index
    %c0_4 = arith.constant 0 : index
    %8 = vector.load %arg9[%c0_3, %c0_4] : memref<1x128xf32, #tpu.memory_space<vmem>>, vector<1x128xf32>
    %9 = vector.broadcast %8 : vector<1x128xf32> to vector<16x128xf32>
    %10 = arith.addf %7, %9 : vector<16x128xf32>
    %c0_5 = arith.constant 0 : index
    %c0_6 = arith.constant 0 : index
    %11 = vector.load %arg2[%c0_5, %c0_6] : memref<128x128xf32, #tpu.memory_space<vmem>>, vector<128x128xf32>
    %cst_7 = arith.constant dense<0.000000e+00> : vector<16x128xf32>
    %12 = tpu.matmul %0, %11, %cst_7 {dimension_numbers = #tpu.dot_dimension_numbers<[1], [0], [0], [1], [0, 0, 1, 1], [], []>} : vector<16x128xf32>, vector<128x128xf32>, vector<16x128xf32> -> vector<16x128xf32>
    %c0_8 = arith.constant 0 : index
    %c0_9 = arith.constant 0 : index
    %13 = vector.load %arg3[%c0_8, %c0_9] : memref<1x128xf32, #tpu.memory_space<vmem>>, vector<1x128xf32>
    %14 = vector.broadcast %13 : vector<1x128xf32> to vector<16x128xf32>
    %15 = arith.addf %12, %14 : vector<16x128xf32>
    %cst_10 = arith.constant 5.000000e-01 : f32
    %16 = vector.broadcast %cst_10 : f32 to vector<16x128xf32>
    %17 = arith.mulf %16, %15 : vector<16x128xf32>
    %cst_11 = arith.constant 0.707106769 : f32
    %18 = vector.broadcast %cst_11 : f32 to vector<16x128xf32>
    %19 = arith.mulf %15, %18 : vector<16x128xf32>
    %20 = math.erf %19 : vector<16x128xf32>
    %cst_12 = arith.constant 1.000000e+00 : f32
    %21 = vector.broadcast %cst_12 : f32 to vector<16x128xf32>
    %22 = arith.addf %21, %20 : vector<16x128xf32>
    %23 = arith.mulf %17, %22 : vector<16x128xf32>
    %cst_13 = arith.constant dense<0.000000e+00> : vector<16xf32>
    %24 = vector.multi_reduction <add>, %23, %cst_13 [1] : vector<16x128xf32> to vector<16xf32>
    %25 = vector.shape_cast %24 : vector<16xf32> to vector<16x1xf32>
    %cst_14 = arith.constant 1.562500e-02 : f32
    %26 = vector.broadcast %cst_14 : f32 to vector<16x1xf32>
    %27 = arith.mulf %25, %26 : vector<16x1xf32>
    %28 = vector.broadcast %27 : vector<16x1xf32> to vector<16x128xf32>
    %29 = arith.subf %23, %28 : vector<16x128xf32>
    %30 = vector.broadcast %5 : vector<1x128xf32> to vector<16x128xf32>
    %31 = arith.mulf %29, %30 : vector<16x128xf32>
    %32 = arith.mulf %31, %31 : vector<16x128xf32>
    %cst_15 = arith.constant dense<0.000000e+00> : vector<16xf32>
    %33 = vector.multi_reduction <add>, %32, %cst_15 [1] : vector<16x128xf32> to vector<16xf32>
    %34 = vector.shape_cast %33 : vector<16xf32> to vector<16x1xf32>
    %cst_16 = arith.constant 1.562500e-02 : f32
    %35 = vector.broadcast %cst_16 : f32 to vector<16x1xf32>
    %36 = arith.mulf %34, %35 : vector<16x1xf32>
    %cst_17 = arith.constant 9.99999974E-6 : f32
    %37 = vector.broadcast %cst_17 : f32 to vector<16x1xf32>
    %38 = arith.addf %36, %37 : vector<16x1xf32>
    %39 = math.rsqrt %38 : vector<16x1xf32>
    %40 = vector.broadcast %39 : vector<16x1xf32> to vector<16x128xf32>
    %41 = arith.mulf %31, %40 : vector<16x128xf32>
    %c0_18 = arith.constant 0 : index
    %c0_19 = arith.constant 0 : index
    %42 = vector.load %arg4[%c0_18, %c0_19] : memref<128x128xf32, #tpu.memory_space<vmem>>, vector<128x128xf32>
    %cst_20 = arith.constant dense<0.000000e+00> : vector<16x128xf32>
    %43 = tpu.matmul %41, %42, %cst_20 {dimension_numbers = #tpu.dot_dimension_numbers<[1], [0], [0], [1], [0, 0, 1, 1], [], []>} : vector<16x128xf32>, vector<128x128xf32>, vector<16x128xf32> -> vector<16x128xf32>
    %c0_21 = arith.constant 0 : index
    %c0_22 = arith.constant 0 : index
    %44 = vector.load %arg5[%c0_21, %c0_22] : memref<1x128xf32, #tpu.memory_space<vmem>>, vector<1x128xf32>
    %45 = vector.broadcast %44 : vector<1x128xf32> to vector<16x128xf32>
    %46 = arith.addf %43, %45 : vector<16x128xf32>
    %cst_23 = arith.constant 5.000000e-01 : f32
    %47 = vector.broadcast %cst_23 : f32 to vector<16x128xf32>
    %48 = arith.mulf %47, %46 : vector<16x128xf32>
    %cst_24 = arith.constant 0.707106769 : f32
    %49 = vector.broadcast %cst_24 : f32 to vector<16x128xf32>
    %50 = arith.mulf %46, %49 : vector<16x128xf32>
    %51 = math.erf %50 : vector<16x128xf32>
    %cst_25 = arith.constant 1.000000e+00 : f32
    %52 = vector.broadcast %cst_25 : f32 to vector<16x128xf32>
    %53 = arith.addf %52, %51 : vector<16x128xf32>
    %54 = arith.mulf %48, %53 : vector<16x128xf32>
    %cst_26 = arith.constant dense<0.000000e+00> : vector<16xf32>
    %55 = vector.multi_reduction <add>, %54, %cst_26 [1] : vector<16x128xf32> to vector<16xf32>
    %56 = vector.shape_cast %55 : vector<16xf32> to vector<16x1xf32>
    %cst_27 = arith.constant 1.562500e-02 : f32
    %57 = vector.broadcast %cst_27 : f32 to vector<16x1xf32>
    %58 = arith.mulf %56, %57 : vector<16x1xf32>
    %59 = vector.broadcast %58 : vector<16x1xf32> to vector<16x128xf32>
    %60 = arith.subf %54, %59 : vector<16x128xf32>
    %61 = vector.broadcast %5 : vector<1x128xf32> to vector<16x128xf32>
    %62 = arith.mulf %60, %61 : vector<16x128xf32>
    %63 = arith.mulf %62, %62 : vector<16x128xf32>
    %cst_28 = arith.constant dense<0.000000e+00> : vector<16xf32>
    %64 = vector.multi_reduction <add>, %63, %cst_28 [1] : vector<16x128xf32> to vector<16xf32>
    %65 = vector.shape_cast %64 : vector<16xf32> to vector<16x1xf32>
    %cst_29 = arith.constant 1.562500e-02 : f32
    %66 = vector.broadcast %cst_29 : f32 to vector<16x1xf32>
    %67 = arith.mulf %65, %66 : vector<16x1xf32>
    %cst_30 = arith.constant 9.99999974E-6 : f32
    %68 = vector.broadcast %cst_30 : f32 to vector<16x1xf32>
    %69 = arith.addf %67, %68 : vector<16x1xf32>
    %70 = math.rsqrt %69 : vector<16x1xf32>
    %71 = vector.broadcast %70 : vector<16x1xf32> to vector<16x128xf32>
    %72 = arith.mulf %62, %71 : vector<16x128xf32>
    %c0_31 = arith.constant 0 : index
    %c0_32 = arith.constant 0 : index
    %73 = vector.load %arg6[%c0_31, %c0_32] : memref<128x128xf32, #tpu.memory_space<vmem>>, vector<128x128xf32>
    %cst_33 = arith.constant dense<0.000000e+00> : vector<16x128xf32>
    %74 = tpu.matmul %72, %73, %cst_33 {dimension_numbers = #tpu.dot_dimension_numbers<[1], [0], [0], [1], [0, 0, 1, 1], [], []>} : vector<16x128xf32>, vector<128x128xf32>, vector<16x128xf32> -> vector<16x128xf32>
    %c0_34 = arith.constant 0 : index
    %c0_35 = arith.constant 0 : index
    %75 = vector.load %arg7[%c0_34, %c0_35] : memref<1x128xf32, #tpu.memory_space<vmem>>, vector<1x128xf32>
    %76 = vector.broadcast %75 : vector<1x128xf32> to vector<16x128xf32>
    %77 = arith.addf %74, %76 : vector<16x128xf32>
    %cst_36 = arith.constant 5.000000e-01 : f32
    %78 = vector.broadcast %cst_36 : f32 to vector<16x128xf32>
    %79 = arith.mulf %78, %77 : vector<16x128xf32>
    %cst_37 = arith.constant 0.707106769 : f32
    %80 = vector.broadcast %cst_37 : f32 to vector<16x128xf32>
    %81 = arith.mulf %77, %80 : vector<16x128xf32>
    %82 = math.erf %81 : vector<16x128xf32>
    %cst_38 = arith.constant 1.000000e+00 : f32
    %83 = vector.broadcast %cst_38 : f32 to vector<16x128xf32>
    %84 = arith.addf %83, %82 : vector<16x128xf32>
    %85 = arith.mulf %79, %84 : vector<16x128xf32>
    %cst_39 = arith.constant dense<0.000000e+00> : vector<16xf32>
    %86 = vector.multi_reduction <add>, %85, %cst_39 [1] : vector<16x128xf32> to vector<16xf32>
    %87 = vector.shape_cast %86 : vector<16xf32> to vector<16x1xf32>
    %cst_40 = arith.constant 1.562500e-02 : f32
    %88 = vector.broadcast %cst_40 : f32 to vector<16x1xf32>
    %89 = arith.mulf %87, %88 : vector<16x1xf32>
    %90 = vector.broadcast %89 : vector<16x1xf32> to vector<16x128xf32>
    %91 = arith.subf %85, %90 : vector<16x128xf32>
    %92 = vector.broadcast %5 : vector<1x128xf32> to vector<16x128xf32>
    %93 = arith.mulf %91, %92 : vector<16x128xf32>
    %94 = arith.mulf %93, %93 : vector<16x128xf32>
    %cst_41 = arith.constant dense<0.000000e+00> : vector<16xf32>
    %95 = vector.multi_reduction <add>, %94, %cst_41 [1] : vector<16x128xf32> to vector<16xf32>
    %96 = vector.shape_cast %95 : vector<16xf32> to vector<16x1xf32>
    %cst_42 = arith.constant 1.562500e-02 : f32
    %97 = vector.broadcast %cst_42 : f32 to vector<16x1xf32>
    %98 = arith.mulf %96, %97 : vector<16x1xf32>
    %cst_43 = arith.constant 9.99999974E-6 : f32
    %99 = vector.broadcast %cst_43 : f32 to vector<16x1xf32>
    %100 = arith.addf %98, %99 : vector<16x1xf32>
    %101 = math.rsqrt %100 : vector<16x1xf32>
    %102 = vector.broadcast %101 : vector<16x1xf32> to vector<16x128xf32>
    %103 = arith.mulf %93, %102 : vector<16x128xf32>
    %104 = arith.addf %103, %10 : vector<16x128xf32>
    %c0_44 = arith.constant 0 : index
    %c0_45 = arith.constant 0 : index
    %105 = vector.load %arg10[%c0_44, %c0_45] : memref<16x128xf32, #tpu.memory_space<vmem>>, vector<16x128xf32>
    tpu.vector_store %arg10[%c0_44, %c0_45], %104 {strides = array<i32>} : memref<16x128xf32, #tpu.memory_space<vmem>>, vector<16x128xf32>,
    return
  }
  func.func @transform_0(%arg0: i32) -> (i32, i32) {
    %c0_i32 = arith.constant 0 : i32
    %c0_i32_0 = arith.constant 0 : i32
    return %arg0, %c0_i32 : i32, i32
  }
  func.func @transform_1(%arg0: i32) -> (i32, i32) {
    %c0_i32 = arith.constant 0 : i32
    %c0_i32_0 = arith.constant 0 : i32
    %c0_i32_1 = arith.constant 0 : i32
    return %c0_i32, %c0_i32_0 : i32, i32
  }
  func.func @transform_2(%arg0: i32) -> (i32, i32) {
    %c0_i32 = arith.constant 0 : i32
    %c0_i32_0 = arith.constant 0 : i32
    %c0_i32_1 = arith.constant 0 : i32
    return %c0_i32, %c0_i32_0 : i32, i32
  }
  func.func @transform_3(%arg0: i32) -> (i32, i32) {
    %c0_i32 = arith.constant 0 : i32
    %c0_i32_0 = arith.constant 0 : i32
    %c0_i32_1 = arith.constant 0 : i32
    return %c0_i32, %c0_i32_0 : i32, i32
  }
  func.func @transform_4(%arg0: i32) -> (i32, i32) {
    %c0_i32 = arith.constant 0 : i32
    %c0_i32_0 = arith.constant 0 : i32
    %c0_i32_1 = arith.constant 0 : i32
    return %c0_i32, %c0_i32_0 : i32, i32
  }
  func.func @transform_5(%arg0: i32) -> (i32, i32) {
    %c0_i32 = arith.constant 0 : i32
    %c0_i32_0 = arith.constant 0 : i32
    %c0_i32_1 = arith.constant 0 : i32
    return %c0_i32, %c0_i32_0 : i32, i32
  }
  func.func @transform_6(%arg0: i32) -> (i32, i32) {
    %c0_i32 = arith.constant 0 : i32
    %c0_i32_0 = arith.constant 0 : i32
    %c0_i32_1 = arith.constant 0 : i32
    return %c0_i32, %c0_i32_0 : i32, i32
  }
  func.func @transform_7(%arg0: i32) -> (i32, i32) {
    %c0_i32 = arith.constant 0 : i32
    %c0_i32_0 = arith.constant 0 : i32
    %c0_i32_1 = arith.constant 0 : i32
    return %c0_i32, %c0_i32_0 : i32, i32
  }
  func.func @transform_8(%arg0: i32) -> (i32, i32) {
    %c0_i32 = arith.constant 0 : i32
    %c0_i32_0 = arith.constant 0 : i32
    %c0_i32_1 = arith.constant 0 : i32
    return %c0_i32, %c0_i32_0 : i32, i32
  }
  func.func @transform_9(%arg0: i32) -> (i32, i32) {
    %c0_i32 = arith.constant 0 : i32
    %c0_i32_0 = arith.constant 0 : i32
    return %arg0, %c0_i32 : i32, i32
  }
}

</mosaic_0001>

<bundles_post_ra>
// kernel: tpu_custom_call.1
= control target key start
LH: loop header
LB: loop body
LE: loop exit
PB: predicated region body
PF: predicated region fallthrough
CT: control target
= control target key end

     0   :  { %14 = vsyncpa [#allocation3], 0  ;;  %s1344_s0 = inlined_call_operand.hbm [shape: f32[16,128], index: 0, kind: input, shape index: {}]   ;;  %s1345_s1 = inlined_call_operand.hbm [shape: f32[128,128], index: 1, kind: input, shape index: {}]   ;;  %s1346_s2 = inlined_call_operand.vmem [shape: f32[1,128], index: 2, kind: input, shape index: {}]   ;;  %s1347_s3 = inlined_call_operand.hbm [shape: f32[128,128], index: 3, kind: input, shape index: {}]   ;;  %s1348_s4 = inlined_call_operand.vmem [shape: f32[1,128], index: 4, kind: input, shape index: {}]   ;;  %s1349_s5 = inlined_call_operand.hbm [shape: f32[128,128], index: 5, kind: input, shape index: {}]   ;;  %s1350_s6 = inlined_call_operand.vmem [shape: f32[1,128], index: 6, kind: input, shape index: {}]   ;;  %s1351_s7 = inlined_call_operand.hbm [shape: f32[128,128], index: 7, kind: input, shape index: {}]   ;;  %s1352_s8 = inlined_call_operand.vmem [shape: f32[1,128], index: 8, kind: input, shape index: {}]   ;;  %s1353_s9 = inlined_call_operand.hbm [shape: f32[16,128], index: 9, kind: output, shape index: {}]  }
   0x1   :  { %15 = vsyncpa [#allocation6], 0 }
   0x2   :  { %16 = vsyncpa [#allocation9], 0 }
   0x3   :  { %17 = vsyncpa [#allocation4], 0  ;;  %s1143_s30 = smov [#allocation5]   ;;  %s1144_s11 = smov [#allocation8]  }
   0x4   :  { %s35_s10 = sshll.u32 %s1143_s30, 4  ;;  %s63_s12 = sshll.u32 %s1144_s11, 4  ;;  %s36_s10 = int_to_ptr.vmem [resolvable:$true] %s35_s10  ;;  %s1202_s12 = int_to_ptr.vmem [resolvable:$true] %s63_s12 }
   0x5   :  { %s1003_s15 = scalar_lea.hbm %s1345_s1, 2048 }
   0x6   :  { %p1004_p0 = scmp.ne.s32.totalorder %s1345_s1, %s1003_s15  ;;  %p1007_p1 = scmp.lt.u32.totalorder %s1003_s15, %s1345_s1 }
   0x8   :  { %p1009_p2 = pnand %p1007_p1, %p1004_p0 }
   0xa   :  { %1012 = shalt.err (!%p1009_p2)
}
   0xb   :  { %s1013_s20 = scalar_lea.vmem %s36_s10, 2048  ;;  %p1018_p4 = scmp.lt.s32.totalorder %s36_s10, %s36_s10 }
   0xc   :  { %p1014_p3 = scmp.ne.s32.totalorder %s36_s10, %s1013_s20  ;;  %p1019_p5 = scmp.lt.s32.totalorder %s1013_s20, %s1013_s20 }
   0xe   :  { %p1020_p6 = por %p1019_p5, %p1018_p4 }
  0x10   :  { %p1021_p7 = pnand %p1020_p6, %p1014_p3 }
  0x12   :  { %1024 = shalt.err (!%p1021_p7)
}
  0x13   :  { %s1145_s21 = smov 128   ;;  %s1146_s22 = smov 8  }
  0x14   :  { %41 = dma.hbm_to_vmem [thread:$0]  %s1345_s1, 2048, %s36_s10, [#allocation6], %s1145_s21, %s1145_s21, %s1146_s22  }
  0x15   :  { %s1025_s27 = scalar_lea.hbm %s1349_s5, 2048 }
  0x16   :  { %p1026_p8 = scmp.ne.s32.totalorder %s1349_s5, %s1025_s27  ;;  %p1029_p9 = scmp.lt.u32.totalorder %s1025_s27, %s1349_s5 }
  0x18   :  { %p1031_p10 = pnand %p1029_p9, %p1026_p8 }
  0x1a   :  { %1034 = shalt.err (!%p1031_p10)
}
  0x1b   :  { %s1035_s13 = scalar_lea.vmem %s1202_s12, 2048  ;;  %p1040_p12 = scmp.lt.s32.totalorder %s1202_s12, %s1202_s12 }
  0x1c   :  { %p1036_p11 = scmp.ne.s32.totalorder %s1202_s12, %s1035_s13  ;;  %p1041_p13 = scmp.lt.s32.totalorder %s1035_s13, %s1035_s13 }
  0x1e   :  { %p1042_p0 = por %p1041_p13, %p1040_p12 }
  0x20   :  { %p1043_p1 = pnand %p1042_p0, %p1036_p11 }
  0x22   :  { %1046 = shalt.err (!%p1043_p1)
}
  0x23   :  { %69 = dma.hbm_to_vmem [thread:$0]  %s1349_s5, 2048, %s1202_s12, [#allocation9], %s1145_s21, %s1145_s21, %s1146_s22  }
  0x24   :  { %s1147_s14 = smov [#allocation2]   ;;  %s1148_s16 = smov [#allocation7]  }
  0x25   :  { %s23_s15 = sshll.u32 %s1147_s14, 4  ;;  %s49_s17 = sshll.u32 %s1148_s16, 4  ;;  %s24_s15 = int_to_ptr.vmem [resolvable:$true] %s23_s15  ;;  %s1239_s17 = int_to_ptr.vmem [resolvable:$true] %s49_s17 }
  0x26   :  { %s1047_s20 = scalar_lea.hbm %s1344_s0, 256 }
  0x27   :  { %p1048_p2 = scmp.ne.s32.totalorder %s1344_s0, %s1047_s20  ;;  %p1051_p3 = scmp.lt.u32.totalorder %s1047_s20, %s1344_s0 }
  0x29   :  { %p1053_p4 = pnand %p1051_p3, %p1048_p2 }
  0x2b   :  { %1056 = shalt.err (!%p1053_p4)
}
  0x2c   :  { %s1057_s5 = scalar_lea.vmem %s24_s15, 256  ;;  %p1062_p6 = scmp.lt.s32.totalorder %s24_s15, %s24_s15 }
  0x2d   :  { %p1058_p5 = scmp.ne.s32.totalorder %s24_s15, %s1057_s5  ;;  %p1063_p7 = scmp.lt.s32.totalorder %s1057_s5, %s1057_s5 }
  0x2f   :  { %p1064_p8 = por %p1063_p7, %p1062_p6 }
  0x31   :  { %p1065_p9 = pnand %p1064_p8, %p1058_p5 }
  0x33   :  { %1068 = shalt.err (!%p1065_p9)
}
  0x34   :  { %29 = dma.hbm_to_vmem [thread:$0]  %s1344_s0, 256, %s24_s15, [#allocation3], %s1145_s21, %s1145_s21, %s1146_s22  }
  0x35   :  { %s1069_s30 = scalar_lea.hbm %s1347_s3, 2048 }
  0x36   :  { %p1070_p10 = scmp.ne.s32.totalorder %s1347_s3, %s1069_s30  ;;  %p1073_p11 = scmp.lt.u32.totalorder %s1069_s30, %s1347_s3 }
  0x38   :  { %p1075_p12 = pnand %p1073_p11, %p1070_p10 }
  0x3a   :  { %1078 = shalt.err (!%p1075_p12)
}
  0x3b   :  { %s1079_s14 = scalar_lea.vmem %s1239_s17, 2048  ;;  %p1084_p0 = scmp.lt.s32.totalorder %s1239_s17, %s1239_s17 }
  0x3c   :  { %p1080_p13 = scmp.ne.s32.totalorder %s1239_s17, %s1079_s14  ;;  %p1085_p1 = scmp.lt.s32.totalorder %s1079_s14, %s1079_s14 }
  0x3e   :  { %p1086_p2 = por %p1085_p1, %p1084_p0 }
  0x40   :  { %p1087_p3 = pnand %p1086_p2, %p1080_p13 }
  0x42   :  { %1090 = shalt.err (!%p1087_p3)
}
  0x43   :  { %55 = dma.hbm_to_vmem [thread:$0]  %s1347_s3, 2048, %s1239_s17, [#allocation6], %s1145_s21, %s1145_s21, %s1146_s22  }
  0x44   :  { %s1149_s16 = smov [#allocation10]   ;;  %s1091_s23 = scalar_lea.hbm %s1351_s7, 2048 }
  0x45   :  { %s77_s18 = sshll.u32 %s1149_s16, 4  ;;  %p1092_p4 = scmp.ne.s32.totalorder %s1351_s7, %s1091_s23  ;;  %s78_s18 = int_to_ptr.vmem [resolvable:$true] %s77_s18 }
  0x46   :  { %p1095_p5 = scmp.lt.u32.totalorder %s1091_s23, %s1351_s7 }
  0x48   :  { %p1097_p6 = pnand %p1095_p5, %p1092_p4 }
  0x4a   :  { %1100 = shalt.err (!%p1097_p6)
}
  0x4b   :  { %s1101_s12 = scalar_lea.vmem %s78_s18, 2048  ;;  %p1106_p8 = scmp.lt.s32.totalorder %s78_s18, %s78_s18 }
  0x4c   :  { %p1102_p7 = scmp.ne.s32.totalorder %s78_s18, %s1101_s12  ;;  %p1107_p9 = scmp.lt.s32.totalorder %s1101_s12, %s1101_s12 }
  0x4e   :  { %p1108_p10 = por %p1107_p9, %p1106_p8 }
  0x50   :  { %p1109_p11 = pnand %p1108_p10, %p1102_p7 }
  0x52   :  { %1112 = shalt.err (!%p1109_p11)
}
  0x53   :  { %83 = dma.hbm_to_vmem [thread:$0]  %s1351_s7, 2048, %s78_s18, [#allocation9], %s1145_s21, %s1145_s21, %s1146_s22  }
  0x54   :  { %1135 = dma.done.wait [#allocation3], 256  }
  0x55   :  { %1136 = vsyncadd [#allocation3], 4294967040 }
  0x56   :  { %1137 = dma.done.wait [#allocation6], 4096  }
  0x57   :  { %1138 = vsyncadd [#allocation6], 4294963200 }
  0x58   :  { %1139 = dma.done.wait [#allocation9], 4096  }
  0x59   :  { %1140 = vsyncadd [#allocation9], 4294963200  ;;  %v206_v0 = vld [vmem:[#allocation5] sm:$0xff]  ;;  %v207_v1 = vld [vmem:[#allocation5 + $0x8] sm:$0xff]  ;;  %s1151_s11 = smov [#allocation11]  }
  0x5a   :  { %v208_v2 = vld [vmem:[#allocation5 + $0x10] sm:$0xff]  ;;  %v874_v3 = vpack.c.bf16 %v207_v1, %v206_v0  ;;  %v209_v4 = vld [vmem:[#allocation5 + $0x18] sm:$0xff]  ;;  %v210_v6 = vld [vmem:[#allocation5 + $0x20] sm:$0xff]  ;;  %s611_s13 = sshll.u32 %s1151_s11, 4  ;;  %s612_s13 = int_to_ptr.vmem [resolvable:$true] %s611_s13 }
  0x5b   :  { %v878_v5 = vpack.c.bf16 %v209_v4, %v208_v2  ;;  %v211_v7 = vld [vmem:[#allocation5 + $0x28] sm:$0xff]  ;;  %v101_v9 = vld [vmem:[#allocation2] sm:$0xff]  ;;  %v213_v11 = vld [vmem:[#allocation5 + $0x38] sm:$0xff]  ;;  %s1113_s1 = scalar_lea.vmem %s612_s13, 256  ;;  %p1118_p13 = scmp.lt.s32.totalorder %s612_s13, %s612_s13 }
  0x5c   :  { %875 = vmatprep.subr.bf16.mxu1 %v874_v3  ;;  %v882_v8 = vpack.c.bf16 %v211_v7, %v210_v6  ;;  %v212_v10 = vld [vmem:[#allocation5 + $0x30] sm:$0xff]  ;;  %769 = vmatprep.mubr.f32.mxu1 %v101_v9  ;;  %v214_v13 = vld [vmem:[#allocation5 + $0x40] sm:$0xff]  ;;  %v215_v14 = vld [vmem:[#allocation5 + $0x48] sm:$0xff]  ;;  %p1114_p12 = scmp.ne.s32.totalorder %s612_s13, %s1113_s1  ;;  %p1119_p0 = scmp.lt.s32.totalorder %s1113_s1, %s1113_s1 }
  0x5d   :  { %877 = vmatpush3.bf16.msra.mxu1 %v874_v3  ;;  %734 = vmatprep.mubr.f32.mxu0 %v101_v9  ;;  %v886_v12 = vpack.c.bf16 %v213_v11, %v212_v10  ;;  %v890_v15 = vpack.c.bf16 %v215_v14, %v214_v13  ;;  %v216_v16 = vld [vmem:[#allocation5 + $0x50] sm:$0xff]  ;;  %v217_v17 = vld [vmem:[#allocation5 + $0x58] sm:$0xff]  ;;  %v218_v19 = vld [vmem:[#allocation5 + $0x60] sm:$0xff]  ;;  %v103_v10 = vlaneseq  ;;  %v1150_v14 = vmov 0.0  }
  0x5e   :  { %879 = vmatprep.subr.bf16.mxu1 %v878_v5  ;;  %v894_v18 = vpack.c.bf16 %v217_v17, %v216_v16  ;;  %v219_v20 = vld [vmem:[#allocation5 + $0x68] sm:$0xff]  ;;  %v220_v22 = vld [vmem:[#allocation5 + $0x70] sm:$0xff]  ;;  %v221_v23 = vld [vmem:[#allocation5 + $0x78] sm:$0xff]  ;;  %p1120_p1 = por %p1119_p0, %p1118_p13 }
  0x5f   :  { %v898_v21 = vpack.c.bf16 %v219_v20, %v218_v19  ;;  %v902_v24 = vpack.c.bf16 %v221_v23, %v220_v22  ;;  %v1291_v25 = vld [vmem:[#allocation2 + $0x8] sm:$0xff]  ;;  %v627_v26 = vld [vmem:[%s1346_s2] ss:$0 sm:$0xff]  ;;  %v108_v41 = vld [vmem:[#allocation10] sm:$0xff]  ;;  %v104_v11 = vand.u32 127, %v103_v10 }
  0x60   :  { %v109_v42 = vld [vmem:[#allocation10 + $0x8] sm:$0xff]  ;;  %v110_v43 = vld [vmem:[#allocation10 + $0x10] sm:$0xff]  ;;  %v111_v45 = vld [vmem:[#allocation10 + $0x18] sm:$0xff]  ;;  %p1121_p2 = pnand %p1120_p1, %p1114_p12 }
  0x61   :  { %881 = vmatpush3.bf16.msra.mxu1 %v878_v5  ;;  %v842_v44 = vpack.c.bf16 %v109_v42, %v108_v41  ;;  %v846_v46 = vpack.c.bf16 %v111_v45, %v110_v43  ;;  %v112_v47 = vld [vmem:[#allocation10 + $0x20] sm:$0xff]  ;;  %v113_v48 = vld [vmem:[#allocation10 + $0x28] sm:$0xff]  ;;  %v114_v50 = vld [vmem:[#allocation10 + $0x30] sm:$0xff]  ;;  %vm105_vm0 = vcmp.lt.s32.totalorder %v104_v11, 64 }
  0x62   :  { %883 = vmatprep.subr.bf16.mxu1 %v882_v8  ;;  %v850_v49 = vpack.c.bf16 %v113_v48, %v112_v47  ;;  %v115_v51 = vld [vmem:[#allocation10 + $0x38] sm:$0xff]  ;;  %v116_v53 = vld [vmem:[#allocation10 + $0x40] sm:$0xff]  ;;  %v117_v54 = vld [vmem:[#allocation10 + $0x48] sm:$0xff] }
  0x63   :  { %843 = vmatprep.subr.bf16.mxu0 %v842_v44  ;;  %v854_v52 = vpack.c.bf16 %v115_v51, %v114_v50  ;;  %v858_v55 = vpack.c.bf16 %v117_v54, %v116_v53  ;;  %v118_v56 = vld [vmem:[#allocation10 + $0x50] sm:$0xff]  ;;  %v119_v57 = vld [vmem:[#allocation10 + $0x58] sm:$0xff]  ;;  %v120_v59 = vld [vmem:[#allocation10 + $0x60] sm:$0xff] }
  0x64   :  { %845 = vmatpush3.bf16.msra.mxu0 %v842_v44  ;;  %v862_v58 = vpack.c.bf16 %v119_v57, %v118_v56  ;;  %v121_v60 = vld [vmem:[#allocation10 + $0x68] sm:$0xff]  ;;  %v122_v62 = vld [vmem:[#allocation10 + $0x70] sm:$0xff]  ;;  %v123_v63 = vld [vmem:[#allocation10 + $0x78] sm:$0xff] }
  0x65   :  { %885 = vmatpush3.bf16.msra.mxu1 %v882_v8  ;;  %847 = vmatprep.subr.bf16.mxu0 %v846_v46  ;;  %v866_v61 = vpack.c.bf16 %v121_v60, %v120_v59  ;;  %v870_v0 = vpack.c.bf16 %v123_v63, %v122_v62  ;;  %v338_v1 = vld [vmem:[#allocation7] sm:$0xff]  ;;  %v339_v2 = vld [vmem:[#allocation7 + $0x8] sm:$0xff]  ;;  %v340_v4 = vld [vmem:[#allocation7 + $0x10] sm:$0xff] }
  0x66   :  { %887 = vmatprep.subr.bf16.mxu1 %v886_v12  ;;  %v906_v3 = vpack.c.bf16 %v339_v2, %v338_v1  ;;  %v341_v5 = vld [vmem:[#allocation7 + $0x18] sm:$0xff]  ;;  %v342_v7 = vld [vmem:[#allocation7 + $0x20] sm:$0xff]  ;;  %v343_v8 = vld [vmem:[#allocation7 + $0x28] sm:$0xff] }
  0x67   :  { %v910_v6 = vpack.c.bf16 %v341_v5, %v340_v4  ;;  %v914_v9 = vpack.c.bf16 %v343_v8, %v342_v7  ;;  %v628_v51 = vld [vmem:[%s1348_s4] ss:$0 sm:$0xff]  ;;  %v470_v2 = vld [vmem:[#allocation8] sm:$0xff] }
  0x68   :  { %849 = vmatpush3.bf16.msra.mxu0 %v846_v46  ;;  %v472_v4 = vld [vmem:[#allocation8 + $0x10] sm:$0xff]  ;;  %v474_v8 = vld [vmem:[#allocation8 + $0x20] sm:$0xff] }
  0x69   :  { %889 = vmatpush3.bf16.msra.mxu1 %v886_v12  ;;  %851 = vmatprep.subr.bf16.mxu0 %v850_v49  ;;  %v476_v11 = vld [vmem:[#allocation8 + $0x30] sm:$0xff] }
  0x6a   :  { %891 = vmatprep.subr.bf16.mxu1 %v890_v15 }
  0x6c   :  { %853 = vmatpush3.bf16.msra.mxu0 %v850_v49 }
  0x6d   :  { %893 = vmatpush3.bf16.msra.mxu1 %v890_v15  ;;  %855 = vmatprep.subr.bf16.mxu0 %v854_v52  ;;  %v1304_v15 = vsel %vm105_vm0, 1.0, %v1150_v14 }
  0x6e   :  { %895 = vmatprep.subr.bf16.mxu1 %v894_v18 }
  0x70   :  { %857 = vmatpush3.bf16.msra.mxu0 %v854_v52 }
  0x71   :  { %897 = vmatpush3.bf16.msra.mxu1 %v894_v18  ;;  %859 = vmatprep.subr.bf16.mxu0 %v858_v55 }
  0x72   :  { %899 = vmatprep.subr.bf16.mxu1 %v898_v21 }
  0x74   :  { %861 = vmatpush3.bf16.msra.mxu0 %v858_v55 }
  0x75   :  { %901 = vmatpush3.bf16.msra.mxu1 %v898_v21  ;;  %863 = vmatprep.subr.bf16.mxu0 %v862_v58 }
  0x76   :  { %903 = vmatprep.subr.bf16.mxu1 %v902_v24 }
  0x78   :  { %865 = vmatpush3.bf16.msra.mxu0 %v862_v58 }
  0x79   :  { %905 = vmatpush3.bf16.msra.mxu1 %v902_v24  ;;  %867 = vmatprep.subr.bf16.mxu0 %v866_v61  ;;  %v344_v24 = vld [vmem:[#allocation7 + $0x30] sm:$0xff] }
  0x7c   :  { %770 = vmatmul.mubr.f32.vlgmr.msra.gmra.mrb[0].mxu1 %v1291_v25  ;;  %869 = vmatpush3.bf16.msra.mxu0 %v866_v61 }
  0x7d   :  { %871 = vmatprep.subr.bf16.mxu0 %v870_v0 }
  0x80   :  { %873 = vmatpush3.bf16.msra.mxu0 %v870_v0 }
  0x81   :  { %907 = vmatprep.subr.bf16.mxu0 %v906_v3 }
  0x83   :  { %735 = vmatmul.mubr.f32.vlgmr.msra.gmra.mrb[0].mxu0 %v1291_v25  ;;  %v345_v25 = vld [vmem:[#allocation7 + $0x38] sm:$0xff] }
  0x84   :  { %909 = vmatpush3.bf16.msra.mxu0 %v906_v3  ;;  %v471_v3 = vld [vmem:[#allocation8 + $0x8] sm:$0xff] }
  0x85   :  { %911 = vmatprep.subr.bf16.mxu0 %v910_v6  ;;  %v938_v5 = vpack.c.bf16 %v471_v3, %v470_v2 }
  0x87   :  { %939 = vmatprep.subr.bf16.mxu1 %v938_v5 }
  0x88   :  { %913 = vmatpush3.bf16.msra.mxu0 %v910_v6  ;;  %v473_v6 = vld [vmem:[#allocation8 + $0x18] sm:$0xff]  ;;  %941 = vmatpush3.bf16.msra.mxu1 %v938_v5 }
  0x89   :  { %915 = vmatprep.subr.bf16.mxu0 %v914_v9  ;;  %v942_v7 = vpack.c.bf16 %v473_v6, %v472_v4 }
  0x8b   :  { %943 = vmatprep.subr.bf16.mxu1 %v942_v7 }
  0x8c   :  { %917 = vmatpush3.bf16.msra.mxu0 %v914_v9  ;;  %v475_v9 = vld [vmem:[#allocation8 + $0x28] sm:$0xff]  ;;  %945 = vmatpush3.bf16.msra.mxu1 %v942_v7 }
  0x8d   :  { %v946_v10 = vpack.c.bf16 %v475_v9, %v474_v8 }
  0x8f   :  { %947 = vmatprep.subr.bf16.mxu1 %v946_v10 }
  0x90   :  { %949 = vmatpush3.bf16.msra.mxu1 %v946_v10 }
 0x14f   :  { %v771_v27 = vpop.f32.mrb[0].mxu1 }
 0x150   :  { %v301_v28 = vadd.f32 %v771_v27, %v627_v26  ;;  %v295_v29 = vpop.f32.mrb[1].mxu1  ;;  %v346_v27 = vld [vmem:[#allocation7 + $0x40] sm:$0xff] }
 0x151   :  { %v296_v30 = vadd.f32 %v627_v26, %v295_v29  ;;  %v918_v26 = vpack.c.bf16 %v345_v25, %v344_v24  ;;  %v478_v25 = vld [vmem:[#allocation8 + $0x40] sm:$0xff] }
 0x152   :  { %v307_v31 = vmul.f32 0.70710677, %v301_v28  ;;  %v305_v39 = vmul.f32 0.5, %v301_v28  ;;  %v347_v28 = vld [vmem:[#allocation7 + $0x48] sm:$0xff] }
 0x153   :  { %v306_v32 = vmul.f32 0.70710677, %v296_v30  ;;  %v304_v35 = vmul.f32 0.5, %v296_v30  ;;  %919 = vmatprep.subr.bf16.mxu0 %v918_v26  ;;  %v922_v29 = vpack.c.bf16 %v347_v28, %v346_v27  ;;  %v348_v30 = vld [vmem:[#allocation7 + $0x50] sm:$0xff] }
 0x154   :  { %979 = verf.f32 %v307_v31  ;;  %921 = vmatpush3.bf16.msra.mxu0 %v918_v26  ;;  %v349_v31 = vld [vmem:[#allocation7 + $0x58] sm:$0xff]  ;;  %v479_v26 = vld [vmem:[#allocation8 + $0x48] sm:$0xff]  ;;  %v480_v28 = vld [vmem:[#allocation8 + $0x50] sm:$0xff] }
 0x155   :  { %981 = verf.f32 %v306_v32  ;;  %923 = vmatprep.subr.bf16.mxu0 %v922_v29  ;;  %v926_v32 = vpack.c.bf16 %v349_v31, %v348_v30  ;;  %v954_v27 = vpack.c.bf16 %v479_v26, %v478_v25  ;;  %v482_v31 = vld [vmem:[#allocation8 + $0x60] sm:$0xff] }
 0x158   :  { %925 = vmatpush3.bf16.msra.mxu0 %v922_v29  ;;  %v481_v29 = vld [vmem:[#allocation8 + $0x58] sm:$0xff] }
 0x159   :  { %927 = vmatprep.subr.bf16.mxu0 %v926_v32  ;;  %v958_v30 = vpack.c.bf16 %v481_v29, %v480_v28 }
 0x15c   :  { %929 = vmatpush3.bf16.msra.mxu0 %v926_v32  ;;  %v483_v32 = vld [vmem:[#allocation8 + $0x68] sm:$0xff] }
 0x15e   :  { %v980_v33 = vpop.eup %979 }
 0x15f   :  { %v982_v34 = vpop.eup %981  ;;  %v311_v38 = vadd.f32 1.0, %v980_v33  ;;  %v350_v33 = vld [vmem:[#allocation7 + $0x60] sm:$0xff] }
 0x160   :  { %v310_v36 = vadd.f32 1.0, %v982_v34  ;;  %v351_v34 = vld [vmem:[#allocation7 + $0x68] sm:$0xff] }
 0x161   :  { %v1300_v40 = vmul.f32 %v311_v38, %v305_v39  ;;  %v1310_v39 = vpop.f32.mrb[0].mxu0 }
 0x162   :  { %v1297_v37 = vmul.f32 %v310_v36, %v304_v35  ;;  %v352_v35 = vld [vmem:[#allocation7 + $0x70] sm:$0xff]  ;;  %v930_v36 = vpack.c.bf16 %v351_v34, %v350_v33  ;;  %v962_v33 = vpack.c.bf16 %v483_v32, %v482_v31 }
 0x163   :  { %v484_v34 = vld [vmem:[#allocation8 + $0x70] sm:$0xff] }
 0x164   :  { %314 = vadd.xlane.f32.xlu0 %v1297_v37  ;;  %931 = vmatprep.subr.bf16.mxu0 %v930_v36 }
 0x165   :  { %933 = vmatpush3.bf16.msra.mxu0 %v930_v36 }
 0x168   :  { %316 = vadd.xlane.f32.xlu0 %v1300_v40 }
 0x1f1   :  { %v315_v12 = vpop.xlane.xlu0 %314 }
 0x1f2   :  { %v318_v13 = vmul.f32 0.015625, %v315_v12  ;;  %v477_v12 = vld [vmem:[#allocation8 + $0x38] sm:$0xff] }
 0x1f4   :  { %v320_v16 = vsub.f32 %v1297_v37, %v318_v13  ;;  %v353_v37 = vld [vmem:[#allocation7 + $0x78] sm:$0xff]  ;;  %v950_v13 = vpack.c.bf16 %v477_v12, %v476_v11 }
 0x1f5   :  { %v317_v17 = vpop.xlane.xlu0 %316  ;;  %v934_v38 = vpack.c.bf16 %v353_v37, %v352_v35  ;;  %v485_v35 = vld [vmem:[#allocation8 + $0x78] sm:$0xff] }
 0x1f6   :  { %v319_v18 = vmul.f32 0.015625, %v317_v17  ;;  %v322_v19 = vmul.f32 %v1304_v15, %v320_v16  ;;  %951 = vmatprep.subr.bf16.mxu1 %v950_v13  ;;  %v966_v36 = vpack.c.bf16 %v485_v35, %v484_v34 }
 0x1f7   :  { %935 = vmatprep.subr.bf16.mxu0 %v934_v38  ;;  %953 = vmatpush3.bf16.msra.mxu1 %v950_v13 }
 0x1f8   :  { %v321_v20 = vsub.f32 %v1300_v40, %v319_v18  ;;  %v324_v21 = vmul.f32 %v322_v19, %v322_v19  ;;  %937 = vmatpush3.bf16.msra.mxu0 %v934_v38  ;;  %v1312_v40 = vpop.f32.mrb[1].mxu0  ;;  %955 = vmatprep.subr.bf16.mxu1 %v954_v27 }
 0x1fa   :  { %326 = vadd.xlane.f32.xlu1 %v324_v21  ;;  %v323_v22 = vmul.f32 %v1304_v15, %v321_v20 }
 0x1fb   :  { %957 = vmatpush3.bf16.msra.mxu1 %v954_v27 }
 0x1fc   :  { %v325_v23 = vmul.f32 %v323_v22, %v323_v22  ;;  %959 = vmatprep.subr.bf16.mxu1 %v958_v30 }
 0x1fe   :  { %328 = vadd.xlane.f32.xlu1 %v325_v23 }
 0x1ff   :  { %961 = vmatpush3.bf16.msra.mxu1 %v958_v30 }
 0x200   :  { %963 = vmatprep.subr.bf16.mxu1 %v962_v33 }
 0x203   :  { %965 = vmatpush3.bf16.msra.mxu1 %v962_v33 }
 0x204   :  { %967 = vmatprep.subr.bf16.mxu1 %v966_v36 }
 0x207   :  { %969 = vmatpush3.bf16.msra.mxu1 %v966_v36 }
 0x287   :  { %v327_v41 = vpop.xlane.xlu1 %326 }
 0x288   :  { %v330_v42 = vmul.f32 0.015625, %v327_v41 }
 0x28a   :  { %v332_v43 = vadd.f32 1e-05, %v330_v42 }
 0x28b   :  { %v329_v44 = vpop.xlane.xlu1 %328 }
 0x28c   :  { %983 = vrsqrt.f32 %v332_v43  ;;  %v331_v45 = vmul.f32 0.015625, %v329_v44 }
 0x28e   :  { %v333_v46 = vadd.f32 1e-05, %v331_v45 }
 0x290   :  { %985 = vrsqrt.f32 %v333_v46 }
 0x296   :  { %v984_v47 = vpop.eup %983 }
 0x297   :  { %v336_v48 = vmul.f32 %v984_v47, %v322_v19 }
 0x299   :  { %804 = vmatprep.mubr.f32.mxu0 %v336_v48 }
 0x29a   :  { %v986_v49 = vpop.eup %985 }
 0x29b   :  { %v337_v50 = vmul.f32 %v986_v49, %v323_v22  ;;  %v629_v49 = vld [vmem:[%s1350_s6] ss:$0 sm:$0xff] }
 0x29d   :  { %805 = vmatmul.mubr.f32.vlgmr.msra.gmra.mrb[2].mxu0 %v337_v50 }
 0x370   :  { %v806_v52 = vpop.f32.mrb[2].mxu0 }
 0x371   :  { %v433_v53 = vadd.f32 %v806_v52, %v628_v51  ;;  %v427_v54 = vpop.f32.mrb[3].mxu0 }
 0x372   :  { %v428_v55 = vadd.f32 %v628_v51, %v427_v54 }
 0x373   :  { %v439_v56 = vmul.f32 0.70710677, %v433_v53  ;;  %v437_v60 = vmul.f32 0.5, %v433_v53 }
 0x374   :  { %v438_v57 = vmul.f32 0.70710677, %v428_v55  ;;  %v436_v62 = vmul.f32 0.5, %v428_v55 }
 0x375   :  { %987 = verf.f32 %v439_v56 }
 0x376   :  { %989 = verf.f32 %v438_v57 }
 0x37f   :  { %v988_v58 = vpop.eup %987 }
 0x380   :  { %v990_v59 = vpop.eup %989  ;;  %v443_v61 = vadd.f32 1.0, %v988_v58 }
 0x381   :  { %v442_v63 = vadd.f32 1.0, %v990_v59 }
 0x382   :  { %v445_v0 = vmul.f32 %v443_v61, %v437_v60 }
 0x383   :  { %v444_v1 = vmul.f32 %v442_v63, %v436_v62 }
 0x384   :  { %448 = vadd.xlane.f32.xlu1 %v445_v0 }
 0x385   :  { %446 = vadd.xlane.f32.xlu0 %v444_v1 }
 0x411   :  { %v449_v14 = vpop.xlane.xlu1 %448 }
 0x412   :  { %v451_v16 = vmul.f32 0.015625, %v449_v14  ;;  %v447_v17 = vpop.xlane.xlu0 %446 }
 0x413   :  { %v450_v18 = vmul.f32 0.015625, %v447_v17  ;;  %v626_v17 = vld [vmem:[%s1352_s8] ss:$0 sm:$0xff] }
 0x414   :  { %v453_v19 = vsub.f32 %v445_v0, %v451_v16 }
 0x415   :  { %v452_v20 = vsub.f32 %v444_v1, %v450_v18 }
 0x416   :  { %v455_v21 = vmul.f32 %v1304_v15, %v453_v19 }
 0x417   :  { %v454_v22 = vmul.f32 %v1304_v15, %v452_v20 }
 0x418   :  { %v457_v23 = vmul.f32 %v455_v21, %v455_v21 }
 0x419   :  { %v456_v24 = vmul.f32 %v454_v22, %v454_v22 }
 0x41a   :  { %460 = vadd.xlane.f32.xlu1 %v457_v23 }
 0x41b   :  { %458 = vadd.xlane.f32.xlu0 %v456_v24 }
 0x4a7   :  { %v461_v37 = vpop.xlane.xlu1 %460 }
 0x4a8   :  { %v463_v38 = vmul.f32 0.015625, %v461_v37  ;;  %v459_v41 = vpop.xlane.xlu0 %458 }
 0x4a9   :  { %v462_v42 = vmul.f32 0.015625, %v459_v41 }
 0x4aa   :  { %v465_v43 = vadd.f32 1e-05, %v463_v38 }
 0x4ab   :  { %v464_v44 = vadd.f32 1e-05, %v462_v42 }
 0x4ac   :  { %991 = vrsqrt.f32 %v465_v43 }
 0x4ad   :  { %993 = vrsqrt.f32 %v464_v44 }
 0x4b6   :  { %v992_v45 = vpop.eup %991 }
 0x4b7   :  { %v994_v46 = vpop.eup %993  ;;  %v469_v48 = vmul.f32 %v992_v45, %v455_v21  ;;  %v198_v21 = vadd.f32 %v626_v17, %v1312_v40 }
 0x4b8   :  { %v468_v47 = vmul.f32 %v994_v46, %v454_v22 }
 0x4ba   :  { %839 = vmatprep.mubr.f32.mxu1 %v468_v47 }
 0x4bb   :  { %840 = vmatmul.mubr.f32.vlgmr.msra.gmra.mrb[2].mxu1 %v469_v48 }
 0x58e   :  { %v841_v50 = vpop.f32.mrb[2].mxu1 }
 0x58f   :  { %v565_v51 = vadd.f32 %v841_v50, %v629_v49  ;;  %v559_v52 = vpop.f32.mrb[3].mxu1 }
 0x590   :  { %v560_v53 = vadd.f32 %v629_v49, %v559_v52 }
 0x591   :  { %v571_v54 = vmul.f32 0.70710677, %v565_v51  ;;  %v569_v58 = vmul.f32 0.5, %v565_v51 }
 0x592   :  { %v570_v55 = vmul.f32 0.70710677, %v560_v53  ;;  %v568_v60 = vmul.f32 0.5, %v560_v53 }
 0x593   :  { %995 = verf.f32 %v571_v54 }
 0x594   :  { %997 = verf.f32 %v570_v55 }
 0x59d   :  { %v996_v56 = vpop.eup %995 }
 0x59e   :  { %v998_v57 = vpop.eup %997  ;;  %v575_v59 = vadd.f32 1.0, %v996_v56 }
 0x59f   :  { %v574_v61 = vadd.f32 1.0, %v998_v57 }
 0x5a0   :  { %v577_v62 = vmul.f32 %v575_v59, %v569_v58 }
 0x5a1   :  { %v576_v63 = vmul.f32 %v574_v61, %v568_v60 }
 0x5a2   :  { %580 = vadd.xlane.f32.xlu1 %v577_v62 }
 0x5a3   :  { %578 = vadd.xlane.f32.xlu0 %v576_v63 }
 0x62f   :  { %v581_v0 = vpop.xlane.xlu1 %580 }
 0x630   :  { %v583_v1 = vmul.f32 0.015625, %v581_v0  ;;  %v579_v2 = vpop.xlane.xlu0 %578 }
 0x631   :  { %v582_v3 = vmul.f32 0.015625, %v579_v2 }
 0x632   :  { %v585_v4 = vsub.f32 %v577_v62, %v583_v1 }
 0x633   :  { %v584_v5 = vsub.f32 %v576_v63, %v582_v3 }
 0x634   :  { %v587_v6 = vmul.f32 %v1304_v15, %v585_v4 }
 0x635   :  { %v586_v7 = vmul.f32 %v1304_v15, %v584_v5  ;;  %v203_v15 = vadd.f32 %v1310_v39, %v626_v17 }
 0x636   :  { %v589_v8 = vmul.f32 %v587_v6, %v587_v6 }
 0x637   :  { %v588_v9 = vmul.f32 %v586_v7, %v586_v7 }
 0x638   :  { %592 = vadd.xlane.f32.xlu1 %v589_v8 }
 0x639   :  { %590 = vadd.xlane.f32.xlu0 %v588_v9 }
 0x6c5   :  { %v593_v10 = vpop.xlane.xlu1 %592 }
 0x6c6   :  { %v595_v11 = vmul.f32 0.015625, %v593_v10  ;;  %v591_v12 = vpop.xlane.xlu0 %590 }
 0x6c7   :  { %v594_v13 = vmul.f32 0.015625, %v591_v12 }
 0x6c8   :  { %v597_v14 = vadd.f32 1e-05, %v595_v11 }
 0x6c9   :  { %v596_v16 = vadd.f32 1e-05, %v594_v13 }
 0x6ca   :  { %999 = vrsqrt.f32 %v597_v14 }
 0x6cb   :  { %1001 = vrsqrt.f32 %v596_v16 }
 0x6d4   :  { %v1000_v18 = vpop.eup %999 }
 0x6d5   :  { %v1002_v19 = vpop.eup %1001  ;;  %v601_v20 = vmul.f32 %v1000_v18, %v587_v6 }
 0x6d6   :  { %v600_v22 = vmul.f32 %v1002_v19, %v586_v7 }
 0x6d7   :  { %v603_v23 = vadd.f32 %v601_v20, %v203_v15 }
 0x6d8   :  { %v602_v24 = vadd.f32 %v600_v22, %v198_v21 }
 0x6d9   :  { %605 = vst [vmem:[#allocation11 + $0x8] sm:$0xff] %v603_v23 }
 0x6da   :  { %604 = vst [vmem:[#allocation11] sm:$0xff] %v602_v24 }
 0x6db   :  { %1124 = shalt.err (!%p1121_p2)
}
 0x6dc   :  { %s1125_s14 = scalar_lea.hbm %s1353_s9, 256 }
 0x6dd   :  { %p1126_p3 = scmp.ne.s32.totalorder %s1353_s9, %s1125_s14  ;;  %p1129_p4 = scmp.lt.u32.totalorder %s1125_s14, %s1353_s9 }
 0x6df   :  { %p1131_p5 = pnand %p1129_p4, %p1126_p3 }
 0x6e1   :  { %1134 = shalt.err (!%p1131_p5)
}
 0x6e2   :  { %617 = dma.vmem_to_hbm [thread:$0]  %s612_s13, 256, %s1353_s9, [#allocation4], %s1145_s21, %s1145_s21, %s1146_s22  }
 0x6e3   :  { %1141 = dma.done.wait [#allocation4], 256  }
 0x6e4   :  { %1142 = vsyncadd [#allocation4], 4294967040 }
 0x6e5   :  { %621 = vsyncpa [#allocation3], 1 }
 0x6e6   :  { %622 = vsyncpa [#allocation6], 1 }
 0x6e7   :  { %623 = vsyncpa [#allocation9], 1 }
 0x6e8   :  { %624 = vsyncpa [#allocation4], 1 }

// kernel: tpu_custom_call.1
= control target key start
LH: loop header
LB: loop body
LE: loop exit
PB: predicated region body
PF: predicated region fallthrough
CT: control target
= control target key end

     0   :  { %14 = vsyncpa [#allocation3], 0  ;;  %s1344_s0 = inlined_call_operand.hbm [shape: f32[16,128], index: 0, kind: input, shape index: {}]   ;;  %s1345_s1 = inlined_call_operand.hbm [shape: f32[128,128], index: 1, kind: input, shape index: {}]   ;;  %s1346_s2 = inlined_call_operand.vmem [shape: f32[1,128], index: 2, kind: input, shape index: {}]   ;;  %s1347_s3 = inlined_call_operand.hbm [shape: f32[128,128], index: 3, kind: input, shape index: {}]   ;;  %s1348_s4 = inlined_call_operand.vmem [shape: f32[1,128], index: 4, kind: input, shape index: {}]   ;;  %s1349_s5 = inlined_call_operand.hbm [shape: f32[128,128], index: 5, kind: input, shape index: {}]   ;;  %s1350_s6 = inlined_call_operand.vmem [shape: f32[1,128], index: 6, kind: input, shape index: {}]   ;;  %s1351_s7 = inlined_call_operand.hbm [shape: f32[128,128], index: 7, kind: input, shape index: {}]   ;;  %s1352_s8 = inlined_call_operand.vmem [shape: f32[1,128], index: 8, kind: input, shape index: {}]   ;;  %s1353_s9 = inlined_call_operand.hbm [shape: f32[16,128], index: 9, kind: output, shape index: {}]  }
   0x1   :  { %15 = vsyncpa [#allocation6], 0 }
   0x2   :  { %16 = vsyncpa [#allocation9], 0 }
   0x3   :  { %17 = vsyncpa [#allocation4], 0  ;;  %s1143_s30 = smov [#allocation5]   ;;  %s1144_s11 = smov [#allocation8]  }
   0x4   :  { %s35_s10 = sshll.u32 %s1143_s30, 4  ;;  %s63_s12 = sshll.u32 %s1144_s11, 4  ;;  %s36_s10 = int_to_ptr.vmem [resolvable:$true] %s35_s10  ;;  %s1202_s12 = int_to_ptr.vmem [resolvable:$true] %s63_s12 }
   0x5   :  { %s1003_s15 = scalar_lea.hbm %s1345_s1, 2048 }
   0x6   :  { %p1004_p0 = scmp.ne.s32.totalorder %s1345_s1, %s1003_s15  ;;  %p1007_p1 = scmp.lt.u32.totalorder %s1003_s15, %s1345_s1 }
   0x8   :  { %p1009_p2 = pnand %p1007_p1, %p1004_p0 }
   0xa   :  { %1012 = shalt.err (!%p1009_p2)
}
   0xb   :  { %s1013_s20 = scalar_lea.vmem %s36_s10, 2048  ;;  %p1018_p4 = scmp.lt.s32.totalorder %s36_s10, %s36_s10 }
   0xc   :  { %p1014_p3 = scmp.ne.s32.totalorder %s36_s10, %s1013_s20  ;;  %p1019_p5 = scmp.lt.s32.totalorder %s1013_s20, %s1013_s20 }
   0xe   :  { %p1020_p6 = por %p1019_p5, %p1018_p4 }
  0x10   :  { %p1021_p7 = pnand %p1020_p6, %p1014_p3 }
  0x12   :  { %1024 = shalt.err (!%p1021_p7)
}
  0x13   :  { %s1145_s21 = smov 128   ;;  %s1146_s22 = smov 8  }
  0x14   :  { %41 = dma.hbm_to_vmem [thread:$0]  %s1345_s1, 2048, %s36_s10, [#allocation6], %s1145_s21, %s1145_s21, %s1146_s22  }
  0x15   :  { %s1025_s27 = scalar_lea.hbm %s1349_s5, 2048 }
  0x16   :  { %p1026_p8 = scmp.ne.s32.totalorder %s1349_s5, %s1025_s27  ;;  %p1029_p9 = scmp.lt.u32.totalorder %s1025_s27, %s1349_s5 }
  0x18   :  { %p1031_p10 = pnand %p1029_p9, %p1026_p8 }
  0x1a   :  { %1034 = shalt.err (!%p1031_p10)
}
  0x1b   :  { %s1035_s13 = scalar_lea.vmem %s1202_s12, 2048  ;;  %p1040_p12 = scmp.lt.s32.totalorder %s1202_s12, %s1202_s12 }
  0x1c   :  { %p1036_p11 = scmp.ne.s32.totalorder %s1202_s12, %s1035_s13  ;;  %p1041_p13 = scmp.lt.s32.totalorder %s1035_s13, %s1035_s13 }
  0x1e   :  { %p1042_p0 = por %p1041_p13, %p1040_p12 }
  0x20   :  { %p1043_p1 = pnand %p1042_p0, %p1036_p11 }
  0x22   :  { %1046 = shalt.err (!%p1043_p1)
}
  0x23   :  { %69 = dma.hbm_to_vmem [thread:$0]  %s1349_s5, 2048, %s1202_s12, [#allocation9], %s1145_s21, %s1145_s21, %s1146_s22  }
  0x24   :  { %s1147_s14 = smov [#allocation2]   ;;  %s1148_s16 = smov [#allocation7]  }
  0x25   :  { %s23_s15 = sshll.u32 %s1147_s14, 4  ;;  %s49_s17 = sshll.u32 %s1148_s16, 4  ;;  %s24_s15 = int_to_ptr.vmem [resolvable:$true] %s23_s15  ;;  %s1239_s17 = int_to_ptr.vmem [resolvable:$true] %s49_s17 }
  0x26   :  { %s1047_s20 = scalar_lea.hbm %s1344_s0, 256 }
  0x27   :  { %p1048_p2 = scmp.ne.s32.totalorder %s1344_s0, %s1047_s20  ;;  %p1051_p3 = scmp.lt.u32.totalorder %s1047_s20, %s1344_s0 }
  0x29   :  { %p1053_p4 = pnand %p1051_p3, %p1048_p2 }
  0x2b   :  { %1056 = shalt.err (!%p1053_p4)
}
  0x2c   :  { %s1057_s5 = scalar_lea.vmem %s24_s15, 256  ;;  %p1062_p6 = scmp.lt.s32.totalorder %s24_s15, %s24_s15 }
  0x2d   :  { %p1058_p5 = scmp.ne.s32.totalorder %s24_s15, %s1057_s5  ;;  %p1063_p7 = scmp.lt.s32.totalorder %s1057_s5, %s1057_s5 }
  0x2f   :  { %p1064_p8 = por %p1063_p7, %p1062_p6 }
  0x31   :  { %p1065_p9 = pnand %p1064_p8, %p1058_p5 }
  0x33   :  { %1068 = shalt.err (!%p1065_p9)
}
  0x34   :  { %29 = dma.hbm_to_vmem [thread:$0]  %s1344_s0, 256, %s24_s15, [#allocation3], %s1145_s21, %s1145_s21, %s1146_s22  }
  0x35   :  { %s1069_s30 = scalar_lea.hbm %s1347_s3, 2048 }
  0x36   :  { %p1070_p10 = scmp.ne.s32.totalorder %s1347_s3, %s1069_s30  ;;  %p1073_p11 = scmp.lt.u32.totalorder %s1069_s30, %s1347_s3 }
  0x38   :  { %p1075_p12 = pnand %p1073_p11, %p1070_p10 }
  0x3a   :  { %1078 = shalt.err (!%p1075_p12)
}
  0x3b   :  { %s1079_s14 = scalar_lea.vmem %s1239_s17, 2048  ;;  %p1084_p0 = scmp.lt.s32.totalorder %s1239_s17, %s1239_s17 }
  0x3c   :  { %p1080_p13 = scmp.ne.s32.totalorder %s1239_s17, %s1079_s14  ;;  %p1085_p1 = scmp.lt.s32.totalorder %s1079_s14, %s1079_s14 }
  0x3e   :  { %p1086_p2 = por %p1085_p1, %p1084_p0 }
  0x40   :  { %p1087_p3 = pnand %p1086_p2, %p1080_p13 }
  0x42   :  { %1090 = shalt.err (!%p1087_p3)
}
  0x43   :  { %55 = dma.hbm_to_vmem [thread:$0]  %s1347_s3, 2048, %s1239_s17, [#allocation6], %s1145_s21, %s1145_s21, %s1146_s22  }
  0x44   :  { %s1149_s16 = smov [#allocation10]   ;;  %s1091_s23 = scalar_lea.hbm %s1351_s7, 2048 }
  0x45   :  { %s77_s18 = sshll.u32 %s1149_s16, 4  ;;  %p1092_p4 = scmp.ne.s32.totalorder %s1351_s7, %s1091_s23  ;;  %s78_s18 = int_to_ptr.vmem [resolvable:$true] %s77_s18 }
  0x46   :  { %p1095_p5 = scmp.lt.u32.totalorder %s1091_s23, %s1351_s7 }
  0x48   :  { %p1097_p6 = pnand %p1095_p5, %p1092_p4 }
  0x4a   :  { %1100 = shalt.err (!%p1097_p6)
}
  0x4b   :  { %s1101_s12 = scalar_lea.vmem %s78_s18, 2048  ;;  %p1106_p8 = scmp.lt.s32.totalorder %s78_s18, %s78_s18 }
  0x4c   :  { %p1102_p7 = scmp.ne.s32.totalorder %s78_s18, %s1101_s12  ;;  %p1107_p9 = scmp.lt.s32.totalorder %s1101_s12, %s1101_s12 }
  0x4e   :  { %p1108_p10 = por %p1107_p9, %p1106_p8 }
  0x50   :  { %p1109_p11 = pnand %p1108_p10, %p1102_p7 }
  0x52   :  { %1112 = shalt.err (!%p1109_p11)
}
  0x53   :  { %83 = dma.hbm_to_vmem [thread:$0]  %s1351_s7, 2048, %s78_s18, [#allocation9], %s1145_s21, %s1145_s21, %s1146_s22  }
  0x54   :  { %1135 = dma.done.wait [#allocation3], 256  }
  0x55   :  { %1136 = vsyncadd [#allocation3], 4294967040 }
  0x56   :  { %1137 = dma.done.wait [#allocation6], 4096  }
  0x57   :  { %1138 = vsyncadd [#allocation6], 4294963200 }
  0x58   :  { %1139 = dma.done.wait [#allocation9], 4096  }
  0x59   :  { %1140 = vsyncadd [#allocation9], 4294963200  ;;  %v206_v0 = vld [vmem:[#allocation5] sm:$0xff]  ;;  %v207_v1 = vld [vmem:[#allocation5 + $0x8] sm:$0xff]  ;;  %s1151_s11 = smov [#allocation11]  }
  0x5a   :  { %v208_v2 = vld [vmem:[#allocation5 + $0x10] sm:$0xff]  ;;  %v874_v3 = vpack.c.bf16 %v207_v1, %v206_v0  ;;  %v209_v4 = vld [vmem:[#allocation5 + $0x18] sm:$0xff]  ;;  %v210_v6 = vld [vmem:[#allocation5 + $0x20] sm:$0xff]  ;;  %s611_s13 = sshll.u32 %s1151_s11, 4  ;;  %s612_s13 = int_to_ptr.vmem [resolvable:$true] %s611_s13 }
  0x5b   :  { %v878_v5 = vpack.c.bf16 %v209_v4, %v208_v2  ;;  %v211_v7 = vld [vmem:[#allocation5 + $0x28] sm:$0xff]  ;;  %v101_v9 = vld [vmem:[#allocation2] sm:$0xff]  ;;  %v213_v11 = vld [vmem:[#allocation5 + $0x38] sm:$0xff]  ;;  %s1113_s1 = scalar_lea.vmem %s612_s13, 256  ;;  %p1118_p13 = scmp.lt.s32.totalorder %s612_s13, %s612_s13 }
  0x5c   :  { %875 = vmatprep.subr.bf16.mxu1 %v874_v3  ;;  %v882_v8 = vpack.c.bf16 %v211_v7, %v210_v6  ;;  %v212_v10 = vld [vmem:[#allocation5 + $0x30] sm:$0xff]  ;;  %769 = vmatprep.mubr.f32.mxu1 %v101_v9  ;;  %v214_v13 = vld [vmem:[#allocation5 + $0x40] sm:$0xff]  ;;  %v215_v14 = vld [vmem:[#allocation5 + $0x48] sm:$0xff]  ;;  %p1114_p12 = scmp.ne.s32.totalorder %s612_s13, %s1113_s1  ;;  %p1119_p0 = scmp.lt.s32.totalorder %s1113_s1, %s1113_s1 }
  0x5d   :  { %877 = vmatpush3.bf16.msra.mxu1 %v874_v3  ;;  %734 = vmatprep.mubr.f32.mxu0 %v101_v9  ;;  %v886_v12 = vpack.c.bf16 %v213_v11, %v212_v10  ;;  %v890_v15 = vpack.c.bf16 %v215_v14, %v214_v13  ;;  %v216_v16 = vld [vmem:[#allocation5 + $0x50] sm:$0xff]  ;;  %v217_v17 = vld [vmem:[#allocation5 + $0x58] sm:$0xff]  ;;  %v218_v19 = vld [vmem:[#allocation5 + $0x60] sm:$0xff]  ;;  %v103_v10 = vlaneseq  ;;  %v1150_v14 = vmov 0.0  }
  0x5e   :  { %879 = vmatprep.subr.bf16.mxu1 %v878_v5  ;;  %v894_v18 = vpack.c.bf16 %v217_v17, %v216_v16  ;;  %v219_v20 = vld [vmem:[#allocation5 + $0x68] sm:$0xff]  ;;  %v220_v22 = vld [vmem:[#allocation5 + $0x70] sm:$0xff]  ;;  %v221_v23 = vld [vmem:[#allocation5 + $0x78] sm:$0xff]  ;;  %p1120_p1 = por %p1119_p0, %p1118_p13 }
  0x5f   :  { %v898_v21 = vpack.c.bf16 %v219_v20, %v218_v19  ;;  %v902_v24 = vpack.c.bf16 %v221_v23, %v220_v22  ;;  %v1291_v25 = vld [vmem:[#allocation2 + $0x8] sm:$0xff]  ;;  %v627_v26 = vld [vmem:[%s1346_s2] ss:$0 sm:$0xff]  ;;  %v108_v41 = vld [vmem:[#allocation10] sm:$0xff]  ;;  %v104_v11 = vand.u32 127, %v103_v10 }
  0x60   :  { %v109_v42 = vld [vmem:[#allocation10 + $0x8] sm:$0xff]  ;;  %v110_v43 = vld [vmem:[#allocation10 + $0x10] sm:$0xff]  ;;  %v111_v45 = vld [vmem:[#allocation10 + $0x18] sm:$0xff]  ;;  %p1121_p2 = pnand %p1120_p1, %p1114_p12 }
  0x61   :  { %881 = vmatpush3.bf16.msra.mxu1 %v878_v5  ;;  %v842_v44 = vpack.c.bf16 %v109_v42, %v108_v41  ;;  %v846_v46 = vpack.c.bf16 %v111_v45, %v110_v43  ;;  %v112_v47 = vld [vmem:[#allocation10 + $0x20] sm:$0xff]  ;;  %v113_v48 = vld [vmem:[#allocation10 + $0x28] sm:$0xff]  ;;  %v114_v50 = vld [vmem:[#allocation10 + $0x30] sm:$0xff]  ;;  %vm105_vm0 = vcmp.lt.s32.totalorder %v104_v11, 64 }
  0x62   :  { %883 = vmatprep.subr.bf16.mxu1 %v882_v8  ;;  %v850_v49 = vpack.c.bf16 %v113_v48, %v112_v47  ;;  %v115_v51 = vld [vmem:[#allocation10 + $0x38] sm:$0xff]  ;;  %v116_v53 = vld [vmem:[#allocation10 + $0x40] sm:$0xff]  ;;  %v117_v54 = vld [vmem:[#allocation10 + $0x48] sm:$0xff] }
  0x63   :  { %843 = vmatprep.subr.bf16.mxu0 %v842_v44  ;;  %v854_v52 = vpack.c.bf16 %v115_v51, %v114_v50  ;;  %v858_v55 = vpack.c.bf16 %v117_v54, %v116_v53  ;;  %v118_v56 = vld [vmem:[#allocation10 + $0x50] sm:$0xff]  ;;  %v119_v57 = vld [vmem:[#allocation10 + $0x58] sm:$0xff]  ;;  %v120_v59 = vld [vmem:[#allocation10 + $0x60] sm:$0xff] }
  0x64   :  { %845 = vmatpush3.bf16.msra.mxu0 %v842_v44  ;;  %v862_v58 = vpack.c.bf16 %v119_v57, %v118_v56  ;;  %v121_v60 = vld [vmem:[#allocation10 + $0x68] sm:$0xff]  ;;  %v122_v62 = vld [vmem:[#allocation10 + $0x70] sm:$0xff]  ;;  %v123_v63 = vld [vmem:[#allocation10 + $0x78] sm:$0xff] }
  0x65   :  { %885 = vmatpush3.bf16.msra.mxu1 %v882_v8  ;;  %847 = vmatprep.subr.bf16.mxu0 %v846_v46  ;;  %v866_v61 = vpack.c.bf16 %v121_v60, %v120_v59  ;;  %v870_v0 = vpack.c.bf16 %v123_v63, %v122_v62  ;;  %v338_v1 = vld [vmem:[#allocation7] sm:$0xff]  ;;  %v339_v2 = vld [vmem:[#allocation7 + $0x8] sm:$0xff]  ;;  %v340_v4 = vld [vmem:[#allocation7 + $0x10] sm:$0xff] }
  0x66   :  { %887 = vmatprep.subr.bf16.mxu1 %v886_v12  ;;  %v906_v3 = vpack.c.bf16 %v339_v2, %v338_v1  ;;  %v341_v5 = vld [vmem:[#allocation7 + $0x18] sm:$0xff]  ;;  %v342_v7 = vld [vmem:[#allocation7 + $0x20] sm:$0xff]  ;;  %v343_v8 = vld [vmem:[#allocation7 + $0x28] sm:$0xff] }
  0x67   :  { %v910_v6 = vpack.c.bf16 %v341_v5, %v340_v4  ;;  %v914_v9 = vpack.c.bf16 %v343_v8, %v342_v7  ;;  %v628_v51 = vld [vmem:[%s1348_s4] ss:$0 sm:$0xff]  ;;  %v470_v2 = vld [vmem:[#allocation8] sm:$0xff] }
  0x68   :  { %849 = vmatpush3.bf16.msra.mxu0 %v846_v46  ;;  %v472_v4 = vld [vmem:[#allocation8 + $0x10] sm:$0xff]  ;;  %v474_v8 = vld [vmem:[#allocation8 + $0x20] sm:$0xff] }
  0x69   :  { %889 = vmatpush3.bf16.msra.mxu1 %v886_v12  ;;  %851 = vmatprep.subr.bf16.mxu0 %v850_v49  ;;  %v476_v11 = vld [vmem:[#allocation8 + $0x30] sm:$0xff] }
  0x6a   :  { %891 = vmatprep.subr.bf16.mxu1 %v890_v15 }
  0x6c   :  { %853 = vmatpush3.bf16.msra.mxu0 %v850_v49 }
  0x6d   :  { %893 = vmatpush3.bf16.msra.mxu1 %v890_v15  ;;  %855 = vmatprep.subr.bf16.mxu0 %v854_v52  ;;  %v1304_v15 = vsel %vm105_vm0, 1.0, %v1150_v14 }
  0x6e   :  { %895 = vmatprep.subr.bf16.mxu1 %v894_v18 }
  0x70   :  { %857 = vmatpush3.bf16.msra.mxu0 %v854_v52 }
  0x71   :  { %897 = vmatpush3.bf16.msra.mxu1 %v894_v18  ;;  %859 = vmatprep.subr.bf16.mxu0 %v858_v55 }
  0x72   :  { %899 = vmatprep.subr.bf16.mxu1 %v898_v21 }
  0x74   :  { %861 = vmatpush3.bf16.msra.mxu0 %v858_v55 }
  0x75   :  { %901 = vmatpush3.bf16.msra.mxu1 %v898_v21  ;;  %863 = vmatprep.subr.bf16.mxu0 %v862_v58 }
  0x76   :  { %903 = vmatprep.subr.bf16.mxu1 %v902_v24 }
  0x78   :  { %865 = vmatpush3.bf16.msra.mxu0 %v862_v58 }
  0x79   :  { %905 = vmatpush3.bf16.msra.mxu1 %v902_v24  ;;  %867 = vmatprep.subr.bf16.mxu0 %v866_v61  ;;  %v344_v24 = vld [vmem:[#allocation7 + $0x30] sm:$0xff] }
  0x7c   :  { %770 = vmatmul.mubr.f32.vlgmr.msra.gmra.mrb[0].mxu1 %v1291_v25  ;;  %869 = vmatpush3.bf16.msra.mxu0 %v866_v61 }
  0x7d   :  { %871 = vmatprep.subr.bf16.mxu0 %v870_v0 }
  0x80   :  { %873 = vmatpush3.bf16.msra.mxu0 %v870_v0 }
  0x81   :  { %907 = vmatprep.subr.bf16.mxu0 %v906_v3 }
  0x83   :  { %735 = vmatmul.mubr.f32.vlgmr.msra.gmra.mrb[0].mxu0 %v1291_v25  ;;  %v345_v25 = vld [vmem:[#allocation7 + $0x38] sm:$0xff] }
  0x84   :  { %909 = vmatpush3.bf16.msra.mxu0 %v906_v3  ;;  %v471_v3 = vld [vmem:[#allocation8 + $0x8] sm:$0xff] }
  0x85   :  { %911 = vmatprep.subr.bf16.mxu0 %v910_v6  ;;  %v938_v5 = vpack.c.bf16 %v471_v3, %v470_v2 }
  0x87   :  { %939 = vmatprep.subr.bf16.mxu1 %v938_v5 }
  0x88   :  { %913 = vmatpush3.bf16.msra.mxu0 %v910_v6  ;;  %v473_v6 = vld [vmem:[#allocation8 + $0x18] sm:$0xff]  ;;  %941 = vmatpush3.bf16.msra.mxu1 %v938_v5 }
  0x89   :  { %915 = vmatprep.subr.bf16.mxu0 %v914_v9  ;;  %v942_v7 = vpack.c.bf16 %v473_v6, %v472_v4 }
  0x8b   :  { %943 = vmatprep.subr.bf16.mxu1 %v942_v7 }
  0x8c   :  { %917 = vmatpush3.bf16.msra.mxu0 %v914_v9  ;;  %v475_v9 = vld [vmem:[#allocation8 + $0x28] sm:$0xff]  ;;  %945 = vmatpush3.bf16.msra.mxu1 %v942_v7 }
  0x8d   :  { %v946_v10 = vpack.c.bf16 %v475_v9, %v474_v8 }
  0x8f   :  { %947 = vmatprep.subr.bf16.mxu1 %v946_v10 }
  0x90   :  { %949 = vmatpush3.bf16.msra.mxu1 %v946_v10 }
 0x14f   :  { %v771_v27 = vpop.f32.mrb[0].mxu1 }
 0x150   :  { %v301_v28 = vadd.f32 %v771_v27, %v627_v26  ;;  %v295_v29 = vpop.f32.mrb[1].mxu1  ;;  %v346_v27 = vld [vmem:[#allocation7 + $0x40] sm:$0xff] }
 0x151   :  { %v296_v30 = vadd.f32 %v627_v26, %v295_v29  ;;  %v918_v26 = vpack.c.bf16 %v345_v25, %v344_v24  ;;  %v478_v25 = vld [vmem:[#allocation8 + $0x40] sm:$0xff] }
 0x152   :  { %v307_v31 = vmul.f32 0.70710677, %v301_v28  ;;  %v305_v39 = vmul.f32 0.5, %v301_v28  ;;  %v347_v28 = vld [vmem:[#allocation7 + $0x48] sm:$0xff] }
 0x153   :  { %v306_v32 = vmul.f32 0.70710677, %v296_v30  ;;  %v304_v35 = vmul.f32 0.5, %v296_v30  ;;  %919 = vmatprep.subr.bf16.mxu0 %v918_v26  ;;  %v922_v29 = vpack.c.bf16 %v347_v28, %v346_v27  ;;  %v348_v30 = vld [vmem:[#allocation7 + $0x50] sm:$0xff] }
 0x154   :  { %979 = verf.f32 %v307_v31  ;;  %921 = vmatpush3.bf16.msra.mxu0 %v918_v26  ;;  %v349_v31 = vld [vmem:[#allocation7 + $0x58] sm:$0xff]  ;;  %v479_v26 = vld [vmem:[#allocation8 + $0x48] sm:$0xff]  ;;  %v480_v28 = vld [vmem:[#allocation8 + $0x50] sm:$0xff] }
 0x155   :  { %981 = verf.f32 %v306_v32  ;;  %923 = vmatprep.subr.bf16.mxu0 %v922_v29  ;;  %v926_v32 = vpack.c.bf16 %v349_v31, %v348_v30  ;;  %v954_v27 = vpack.c.bf16 %v479_v26, %v478_v25  ;;  %v482_v31 = vld [vmem:[#allocation8 + $0x60] sm:$0xff] }
 0x158   :  { %925 = vmatpush3.bf16.msra.mxu0 %v922_v29  ;;  %v481_v29 = vld [vmem:[#allocation8 + $0x58] sm:$0xff] }
 0x159   :  { %927 = vmatprep.subr.bf16.mxu0 %v926_v32  ;;  %v958_v30 = vpack.c.bf16 %v481_v29, %v480_v28 }
 0x15c   :  { %929 = vmatpush3.bf16.msra.mxu0 %v926_v32  ;;  %v483_v32 = vld [vmem:[#allocation8 + $0x68] sm:$0xff] }
 0x15e   :  { %v980_v33 = vpop.eup %979 }
 0x15f   :  { %v982_v34 = vpop.eup %981  ;;  %v311_v38 = vadd.f32 1.0, %v980_v33  ;;  %v350_v33 = vld [vmem:[#allocation7 + $0x60] sm:$0xff] }
 0x160   :  { %v310_v36 = vadd.f32 1.0, %v982_v34  ;;  %v351_v34 = vld [vmem:[#allocation7 + $0x68] sm:$0xff] }
 0x161   :  { %v1300_v40 = vmul.f32 %v311_v38, %v305_v39  ;;  %v1310_v39 = vpop.f32.mrb[0].mxu0 }
 0x162   :  { %v1297_v37 = vmul.f32 %v310_v36, %v304_v35  ;;  %v352_v35 = vld [vmem:[#allocation7 + $0x70] sm:$0xff]  ;;  %v930_v36 = vpack.c.bf16 %v351_v34, %v350_v33  ;;  %v962_v33 = vpack.c.bf16 %v483_v32, %v482_v31 }
 0x163   :  { %v484_v34 = vld [vmem:[#allocation8 + $0x70] sm:$0xff] }
 0x164   :  { %314 = vadd.xlane.f32.xlu0 %v1297_v37  ;;  %931 = vmatprep.subr.bf16.mxu0 %v930_v36 }
 0x165   :  { %933 = vmatpush3.bf16.msra.mxu0 %v930_v36 }
 0x168   :  { %316 = vadd.xlane.f32.xlu0 %v1300_v40 }
 0x1f1   :  { %v315_v12 = vpop.xlane.xlu0 %314 }
 0x1f2   :  { %v318_v13 = vmul.f32 0.015625, %v315_v12  ;;  %v477_v12 = vld [vmem:[#allocation8 + $0x38] sm:$0xff] }
 0x1f4   :  { %v320_v16 = vsub.f32 %v1297_v37, %v318_v13  ;;  %v353_v37 = vld [vmem:[#allocation7 + $0x78] sm:$0xff]  ;;  %v950_v13 = vpack.c.bf16 %v477_v12, %v476_v11 }
 0x1f5   :  { %v317_v17 = vpop.xlane.xlu0 %316  ;;  %v934_v38 = vpack.c.bf16 %v353_v37, %v352_v35  ;;  %v485_v35 = vld [vmem:[#allocation8 + $0x78] sm:$0xff] }
 0x1f6   :  { %v319_v18 = vmul.f32 0.015625, %v317_v17  ;;  %v322_v19 = vmul.f32 %v1304_v15, %v320_v16  ;;  %951 = vmatprep.subr.bf16.mxu1 %v950_v13  ;;  %v966_v36 = vpack.c.bf16 %v485_v35, %v484_v34 }
 0x1f7   :  { %935 = vmatprep.subr.bf16.mxu0 %v934_v38  ;;  %953 = vmatpush3.bf16.msra.mxu1 %v950_v13 }
 0x1f8   :  { %v321_v20 = vsub.f32 %v1300_v40, %v319_v18  ;;  %v324_v21 = vmul.f32 %v322_v19, %v322_v19  ;;  %937 = vmatpush3.bf16.msra.mxu0 %v934_v38  ;;  %v1312_v40 = vpop.f32.mrb[1].mxu0  ;;  %955 = vmatprep.subr.bf16.mxu1 %v954_v27 }
 0x1fa   :  { %326 = vadd.xlane.f32.xlu1 %v324_v21  ;;  %v323_v22 = vmul.f32 %v1304_v15, %v321_v20 }
 0x1fb   :  { %957 = vmatpush3.bf16.msra.mxu1 %v954_v27 }
 0x1fc   :  { %v325_v23 = vmul.f32 %v323_v22, %v323_v22  ;;  %959 = vmatprep.subr.bf16.mxu1 %v958_v30 }
 0x1fe   :  { %328 = vadd.xlane.f32.xlu1 %v325_v23 }
 0x1ff   :  { %961 = vmatpush3.bf16.msra.mxu1 %v958_v30 }
 0x200   :  { %963 = vmatprep.subr.bf16.mxu1 %v962_v33 }
 0x203   :  { %965 = vmatpush3.bf16.msra.mxu1 %v962_v33 }
 0x204   :  { %967 = vmatprep.subr.bf16.mxu1 %v966_v36 }
 0x207   :  { %969 = vmatpush3.bf16.msra.mxu1 %v966_v36 }
 0x287   :  { %v327_v41 = vpop.xlane.xlu1 %326 }
 0x288   :  { %v330_v42 = vmul.f32 0.015625, %v327_v41 }
 0x28a   :  { %v332_v43 = vadd.f32 1e-05, %v330_v42 }
 0x28b   :  { %v329_v44 = vpop.xlane.xlu1 %328 }
 0x28c   :  { %983 = vrsqrt.f32 %v332_v43  ;;  %v331_v45 = vmul.f32 0.015625, %v329_v44 }
 0x28e   :  { %v333_v46 = vadd.f32 1e-05, %v331_v45 }
 0x290   :  { %985 = vrsqrt.f32 %v333_v46 }
 0x296   :  { %v984_v47 = vpop.eup %983 }
 0x297   :  { %v336_v48 = vmul.f32 %v984_v47, %v322_v19 }
 0x299   :  { %804 = vmatprep.mubr.f32.mxu0 %v336_v48 }
 0x29a   :  { %v986_v49 = vpop.eup %985 }
 0x29b   :  { %v337_v50 = vmul.f32 %v986_v49, %v323_v22  ;;  %v629_v49 = vld [vmem:[%s1350_s6] ss:$0 sm:$0xff] }
 0x29d   :  { %805 = vmatmul.mubr.f32.vlgmr.msra.gmra.mrb[2].mxu0 %v337_v50 }
 0x370   :  { %v806_v52 = vpop.f32.mrb[2].mxu0 }
 0x371   :  { %v433_v53 = vadd.f32 %v806_v52, %v628_v51  ;;  %v427_v54 = vpop.f32.mrb[3].mxu0 }
 0x372   :  { %v428_v55 = vadd.f32 %v628_v51, %v427_v54 }
 0x373   :  { %v439_v56 = vmul.f32 0.70710677, %v433_v53  ;;  %v437_v60 = vmul.f32 0.5, %v433_v53 }
 0x374   :  { %v438_v57 = vmul.f32 0.70710677, %v428_v55  ;;  %v436_v62 = vmul.f32 0.5, %v428_v55 }
 0x375   :  { %987 = verf.f32 %v439_v56 }
 0x376   :  { %989 = verf.f32 %v438_v57 }
 0x37f   :  { %v988_v58 = vpop.eup %987 }
 0x380   :  { %v990_v59 = vpop.eup %989  ;;  %v443_v61 = vadd.f32 1.0, %v988_v58 }
 0x381   :  { %v442_v63 = vadd.f32 1.0, %v990_v59 }
 0x382   :  { %v445_v0 = vmul.f32 %v443_v61, %v437_v60 }
 0x383   :  { %v444_v1 = vmul.f32 %v442_v63, %v436_v62 }
 0x384   :  { %448 = vadd.xlane.f32.xlu1 %v445_v0 }
 0x385   :  { %446 = vadd.xlane.f32.xlu0 %v444_v1 }
 0x411   :  { %v449_v14 = vpop.xlane.xlu1 %448 }
 0x412   :  { %v451_v16 = vmul.f32 0.015625, %v449_v14  ;;  %v447_v17 = vpop.xlane.xlu0 %446 }
 0x413   :  { %v450_v18 = vmul.f32 0.015625, %v447_v17  ;;  %v626_v17 = vld [vmem:[%s1352_s8] ss:$0 sm:$0xff] }
 0x414   :  { %v453_v19 = vsub.f32 %v445_v0, %v451_v16 }
 0x415   :  { %v452_v20 = vsub.f32 %v444_v1, %v450_v18 }
 0x416   :  { %v455_v21 = vmul.f32 %v1304_v15, %v453_v19 }
 0x417   :  { %v454_v22 = vmul.f32 %v1304_v15, %v452_v20 }
 0x418   :  { %v457_v23 = vmul.f32 %v455_v21, %v455_v21 }
 0x419   :  { %v456_v24 = vmul.f32 %v454_v22, %v454_v22 }
 0x41a   :  { %460 = vadd.xlane.f32.xlu1 %v457_v23 }
 0x41b   :  { %458 = vadd.xlane.f32.xlu0 %v456_v24 }
 0x4a7   :  { %v461_v37 = vpop.xlane.xlu1 %460 }
 0x4a8   :  { %v463_v38 = vmul.f32 0.015625, %v461_v37  ;;  %v459_v41 = vpop.xlane.xlu0 %458 }
 0x4a9   :  { %v462_v42 = vmul.f32 0.015625, %v459_v41 }
 0x4aa   :  { %v465_v43 = vadd.f32 1e-05, %v463_v38 }
 0x4ab   :  { %v464_v44 = vadd.f32 1e-05, %v462_v42 }
 0x4ac   :  { %991 = vrsqrt.f32 %v465_v43 }
 0x4ad   :  { %993 = vrsqrt.f32 %v464_v44 }
 0x4b6   :  { %v992_v45 = vpop.eup %991 }
 0x4b7   :  { %v994_v46 = vpop.eup %993  ;;  %v469_v48 = vmul.f32 %v992_v45, %v455_v21  ;;  %v198_v21 = vadd.f32 %v626_v17, %v1312_v40 }
 0x4b8   :  { %v468_v47 = vmul.f32 %v994_v46, %v454_v22 }
 0x4ba   :  { %839 = vmatprep.mubr.f32.mxu1 %v468_v47 }
 0x4bb   :  { %840 = vmatmul.mubr.f32.vlgmr.msra.gmra.mrb[2].mxu1 %v469_v48 }
 0x58e   :  { %v841_v50 = vpop.f32.mrb[2].mxu1 }
 0x58f   :  { %v565_v51 = vadd.f32 %v841_v50, %v629_v49  ;;  %v559_v52 = vpop.f32.mrb[3].mxu1 }
 0x590   :  { %v560_v53 = vadd.f32 %v629_v49, %v559_v52 }
 0x591   :  { %v571_v54 = vmul.f32 0.70710677, %v565_v51  ;;  %v569_v58 = vmul.f32 0.5, %v565_v51 }
 0x592   :  { %v570_v55 = vmul.f32 0.70710677, %v560_v53  ;;  %v568_v60 = vmul.f32 0.5, %v560_v53 }
 0x593   :  { %995 = verf.f32 %v571_v54 }
 0x594   :  { %997 = verf.f32 %v570_v55 }
 0x59d   :  { %v996_v56 = vpop.eup %995 }
 0x59e   :  { %v998_v57 = vpop.eup %997  ;;  %v575_v59 = vadd.f32 1.0, %v996_v56 }
 0x59f   :  { %v574_v61 = vadd.f32 1.0, %v998_v57 }
 0x5a0   :  { %v577_v62 = vmul.f32 %v575_v59, %v569_v58 }
 0x5a1   :  { %v576_v63 = vmul.f32 %v574_v61, %v568_v60 }
 0x5a2   :  { %580 = vadd.xlane.f32.xlu1 %v577_v62 }
 0x5a3   :  { %578 = vadd.xlane.f32.xlu0 %v576_v63 }
 0x62f   :  { %v581_v0 = vpop.xlane.xlu1 %580 }
 0x630   :  { %v583_v1 = vmul.f32 0.015625, %v581_v0  ;;  %v579_v2 = vpop.xlane.xlu0 %578 }
 0x631   :  { %v582_v3 = vmul.f32 0.015625, %v579_v2 }
 0x632   :  { %v585_v4 = vsub.f32 %v577_v62, %v583_v1 }
 0x633   :  { %v584_v5 = vsub.f32 %v576_v63, %v582_v3 }
 0x634   :  { %v587_v6 = vmul.f32 %v1304_v15, %v585_v4 }
 0x635   :  { %v586_v7 = vmul.f32 %v1304_v15, %v584_v5  ;;  %v203_v15 = vadd.f32 %v1310_v39, %v626_v17 }
 0x636   :  { %v589_v8 = vmul.f32 %v587_v6, %v587_v6 }
 0x637   :  { %v588_v9 = vmul.f32 %v586_v7, %v586_v7 }
 0x638   :  { %592 = vadd.xlane.f32.xlu1 %v589_v8 }
 0x639   :  { %590 = vadd.xlane.f32.xlu0 %v588_v9 }
 0x6c5   :  { %v593_v10 = vpop.xlane.xlu1 %592 }
 0x6c6   :  { %v595_v11 = vmul.f32 0.015625, %v593_v10  ;;  %v591_v12 = vpop.xlane.xlu0 %590 }
 0x6c7   :  { %v594_v13 = vmul.f32 0.015625, %v591_v12 }
 0x6c8   :  { %v597_v14 = vadd.f32 1e-05, %v595_v11 }
 0x6c9   :  { %v596_v16 = vadd.f32 1e-05, %v594_v13 }
 0x6ca   :  { %999 = vrsqrt.f32 %v597_v14 }
 0x6cb   :  { %1001 = vrsqrt.f32 %v596_v16 }
 0x6d4   :  { %v1000_v18 = vpop.eup %999 }
 0x6d5   :  { %v1002_v19 = vpop.eup %1001  ;;  %v601_v20 = vmul.f32 %v1000_v18, %v587_v6 }
 0x6d6   :  { %v600_v22 = vmul.f32 %v1002_v19, %v586_v7 }
 0x6d7   :  { %v603_v23 = vadd.f32 %v601_v20, %v203_v15 }
 0x6d8   :  { %v602_v24 = vadd.f32 %v600_v22, %v198_v21 }
 0x6d9   :  { %605 = vst [vmem:[#allocation11 + $0x8] sm:$0xff] %v603_v23 }
 0x6da   :  { %604 = vst [vmem:[#allocation11] sm:$0xff] %v602_v24 }
 0x6db   :  { %1124 = shalt.err (!%p1121_p2)
}
 0x6dc   :  { %s1125_s14 = scalar_lea.hbm %s1353_s9, 256 }
 0x6dd   :  { %p1126_p3 = scmp.ne.s32.totalorder %s1353_s9, %s1125_s14  ;;  %p1129_p4 = scmp.lt.u32.totalorder %s1125_s14, %s1353_s9 }
 0x6df   :  { %p1131_p5 = pnand %p1129_p4, %p1126_p3 }
 0x6e1   :  { %1134 = shalt.err (!%p1131_p5)
}
 0x6e2   :  { %617 = dma.vmem_to_hbm [thread:$0]  %s612_s13, 256, %s1353_s9, [#allocation4], %s1145_s21, %s1145_s21, %s1146_s22  }
 0x6e3   :  { %1141 = dma.done.wait [#allocation4], 256  }
 0x6e4   :  { %1142 = vsyncadd [#allocation4], 4294967040 }
 0x6e5   :  { %621 = vsyncpa [#allocation3], 1 }
 0x6e6   :  { %622 = vsyncpa [#allocation6], 1 }
 0x6e7   :  { %623 = vsyncpa [#allocation9], 1 }
 0x6e8   :  { %624 = vsyncpa [#allocation4], 1 }

</bundles_post_ra>
